<compile_context>
chip_gen: v6e
topology: v6e:2x2x1
jax: 0.10.0
libtpu: 0.0.40
codegen_flags: <defaults>
</compile_context>

<pallas_src>
import math

import jax
import jax.numpy as jnp
from jax import lax
from jax.experimental import pallas as pl
from jax.experimental.pallas import tpu as pltpu

N_ATTENTIONS = 3   # n_attentions in the PyTorch module (baked into the kernel)
LANE = 128         # TPU lane width


def _round_up(n, m):
    return max(m, pl.cdiv(n, m) * m)


def _make_kernel(batch, seq, att_dim):
    """Kernel factory; batch/seq/att_dim are static and baked into the trace."""
    scale = 1.0 / math.sqrt(att_dim)
    f32 = jnp.float32

    def kernel(x_ref, w0_ref, b0_ref, wqkv_ref, bqkv_ref, wo_ref, bo_ref,
               out_ref):
        A = w0_ref.shape[1]          # padded attention width (multiple of 128)

        # Input Linear + ReLU on the whole (batch*seq, d_in_pad) slab: the
        # batch is folded into the matmul M dimension (denser MXU pushes).
        h = jnp.dot(x_ref[...], w0_ref[...], preferred_element_type=f32)
        h = jnp.maximum(h + b0_ref[...], 0.0)                       # (M, A)

        # TODO(synk): SelfAttentionBlock source was not provided in the spec;
        # assumed standard single-head scaled-dot-product self-attention
        # (Q/K/V Linear, softmax(QK^T / sqrt(att_dim)) @ V) with a residual.
        for i in range(N_ATTENTIONS):
            # Fused Q|K|V projection over the whole slab.  The fused weight is
            # zero-padded so each segment starts at a 128-lane boundary ->
            # slicing below is a free (tile-aligned) view, no relayout.
            qkv = (jnp.dot(h, wqkv_ref[i], preferred_element_type=f32)
                   + bqkv_ref[i])                                   # (M, 3A)
            q = qkv[:, 0 * A:1 * A]
            k = qkv[:, 1 * A:2 * A]
            v = qkv[:, 2 * A:3 * A]

            # Attention stays per-problem: short unrolled loop over the tiny
            # static batch; row slices are sublane-tile aligned (seq == 8).
            attn_rows = []
            for b in range(batch):
                rows = slice(b * seq, (b + 1) * seq)
                qb, kb, vb = q[rows], k[rows], v[rows]
                # Contract the feature axis of both operands (padded lanes are
                # zero, so this equals the unpadded att_dim-wide dot).  If
                # Mosaic inserts a tiny 8xA transpose of kb it is accepted --
                # negligible at this size.
                sb = lax.dot_general(
                    qb, kb, dimension_numbers=(((1,), (1,)), ((), ())),
                    preferred_element_type=f32) * scale
                sb = sb - jnp.max(sb, axis=-1, keepdims=True)
                pb = jnp.exp(sb)
                pb = pb / jnp.sum(pb, axis=-1, keepdims=True)   # exact softmax
                attn_rows.append(jnp.dot(pb, vb, preferred_element_type=f32))
            h = jnp.concatenate(attn_rows, axis=0) + h          # residual add

        # Output layer: ReLU then Linear.  Output columns are padded to a
        # multiple of 128 lanes, so the final store is an unmasked full vst.
        h = jnp.maximum(h, 0.0)
        out_ref[...] = (jnp.dot(h, wo_ref[...], preferred_element_type=f32)
                        + bo_ref[...]).astype(out_ref.dtype)

    return kernel


def prepare_params(params):
    """Fuse Q/K/V weights and zero-pad everything to lane-aligned shapes.

    Done ONCE at init time (hoisted out of the per-call path, per review).
    """
    f32 = jnp.float32
    d_in, a = params["w0"].shape
    d_out = params["wo"].shape[1]
    n_att = params["wq"].shape[0]
    assert n_att == N_ATTENTIONS

    d_in_p = _round_up(d_in, LANE)
    a_p = _round_up(a, LANE)
    d_out_p = _round_up(d_out, LANE)

    w0 = jnp.zeros((d_in_p, a_p), f32).at[:d_in, :a].set(
        params["w0"].astype(f32))
    b0 = jnp.zeros((1, a_p), f32).at[:, :a].set(params["b0"].astype(f32))

    # Fused Q|K|V: segment j occupies lanes [j*a_p, j*a_p + a); rest is zero.
    wqkv = jnp.zeros((n_att, a_p, 3 * a_p), f32)
    bqkv = jnp.zeros((n_att, 1, 3 * a_p), f32)
    for j, (wn, bn) in enumerate((("wq", "bq"), ("wk", "bk"), ("wv", "bv"))):
        wqkv = wqkv.at[:, :a, j * a_p:j * a_p + a].set(params[wn].astype(f32))
        bqkv = bqkv.at[:, :, j * a_p:j * a_p + a].set(params[bn].astype(f32))

    wo = jnp.zeros((a_p, d_out_p), f32).at[:a, :d_out].set(
        params["wo"].astype(f32))
    bo = jnp.zeros((1, d_out_p), f32).at[:, :d_out].set(
        params["bo"].astype(f32))

    meta = dict(d_in=d_in, a=a, d_out=d_out,
                d_in_p=d_in_p, a_p=a_p, d_out_p=d_out_p, n_att=n_att)
    return (w0, b0, wqkv, bqkv, wo, bo), meta


def weights_generator(x, prepared, meta):
    """x: (B, N, input_dim) float32 -> (B, N, output_dim) float32."""
    f32 = jnp.float32
    w0, b0, wqkv, bqkv, wo, bo = prepared
    B, N, d_in = x.shape
    assert d_in == meta["d_in"]
    M = B * N
    d_in_p, a_p, d_out_p = meta["d_in_p"], meta["a_p"], meta["d_out_p"]

    # Fold batch into the row (M) dimension and pad the feature dim to a full
    # 128-lane tile so the input DMA / loads are unmasked and dense.
    x_pad = jnp.zeros((M, d_in_p), f32).at[:, :d_in].set(
        x.reshape(M, d_in).astype(f32))

    n_att = meta["n_att"]
    flops = int(2 * M * d_in_p * a_p
                + n_att * (2 * M * a_p * 3 * a_p      # fused QKV projection
                           + 2 * M * a_p * N          # Q @ K^T
                           + 2 * M * N * a_p)         # P @ V
                + 2 * M * a_p * d_out_p)              # output Linear
    transcendentals = int(n_att * M * N)              # softmax exp
    bytes_accessed = int(4 * (x_pad.size + w0.size + b0.size + wqkv.size
                              + bqkv.size + wo.size + bo.size + M * d_out_p))

    # Single grid step: all B problems per invocation.  Total VMEM footprint
    # (weights + activations) is well under 1 MiB, so no tiling is needed on
    # any generation, and a 2-way megacore split is not worth it at B=4.
    out_pad = pl.pallas_call(
        _make_kernel(B, N, meta["a"]),
        out_shape=jax.ShapeDtypeStruct((M, d_out_p), f32),
        in_specs=[pl.BlockSpec(memory_space=pltpu.MemorySpace.VMEM)] * 7,
        out_specs=pl.BlockSpec(memory_space=pltpu.MemorySpace.VMEM),
        cost_estimate=pl.CostEstimate(flops=flops,
                                      transcendentals=transcendentals,
                                      bytes_accessed=bytes_accessed),
    )(x_pad, w0, b0, wqkv, bqkv, wo, bo)

    return out_pad.reshape(B, N, d_out_p)[..., :meta["d_out"]]


def init_params(key, input_dim, output_dim, hidden_dims=(128, 64),
                n_attentions=N_ATTENTIONS):
    a = hidden_dims[-1]                 # attention_dim = hidden_dims[-1]
    ks = jax.random.split(key, 10)

    def w(k, fan_in, shape):
        return jax.random.normal(k, shape, jnp.float32) / jnp.sqrt(fan_in)

    return {
        "w0": w(ks[0], input_dim, (input_dim, a)),
        "b0": 0.01 * jax.random.normal(ks[1], (1, a), jnp.float32),
        "wq": w(ks[2], a, (n_attentions, a, a)),
        "bq": 0.01 * jax.random.normal(ks[3], (n_attentions, 1, a), jnp.float32),
        "wk": w(ks[4], a, (n_attentions, a, a)),
        "bk": 0.01 * jax.random.normal(ks[5], (n_attentions, 1, a), jnp.float32),
        "wv": w(ks[6], a, (n_attentions, a, a)),
        "bv": 0.01 * jax.random.normal(ks[7], (n_attentions, 1, a), jnp.float32),
        "wo": w(ks[8], a, (a, output_dim)),
        "bo": 0.01 * jax.random.normal(ks[9], (1, output_dim), jnp.float32),
    }


def reference_forward(x, params):
    """Pure-JAX float32 reference of the same forward pass (HIGHEST precision)."""
    hp = lax.Precision.HIGHEST
    a = params["w0"].shape[1]
    scale = 1.0 / math.sqrt(a)

    h = jnp.maximum(
        jnp.einsum("bnd,dk->bnk", x, params["w0"], precision=hp)
        + params["b0"], 0.0)
    for i in range(N_ATTENTIONS):
        q = jnp.einsum("bnd,dk->bnk", h, params["wq"][i], precision=hp) + params["bq"][i]
        k = jnp.einsum("bnd,dk->bnk", h, params["wk"][i], precision=hp) + params["bk"][i]
        v = jnp.einsum("bnd,dk->bnk", h, params["wv"][i], precision=hp) + params["bv"][i]
        s = jnp.einsum("bqd,bkd->bqk", q, k, precision=hp) * scale
        p = jax.nn.softmax(s, axis=-1)
        h = jnp.einsum("bqk,bkd->bqd", p, v, precision=hp) + h
    h = jnp.maximum(h, 0.0)
    return jnp.einsum("bnd,dk->bnk", h, params["wo"], precision=hp) + params["bo"]


if __name__ == "__main__":
    B, N, INPUT_DIM, OUTPUT_DIM = 4, 8, 16, 32
    key = jax.random.PRNGKey(0)
    kx, kp = jax.random.split(key)
    x = jax.random.normal(kx, (B, N, INPUT_DIM), jnp.float32)
    params = init_params(kp, INPUT_DIM, OUTPUT_DIM)

    prepared, meta = prepare_params(params)      # one-time pad/fuse of params

    out = jax.block_until_ready(weights_generator(x, prepared, meta))
    ref = reference_forward(x, params)

    assert out.shape == (B, N, OUTPUT_DIM)
    # Kernel is f32 with exact softmax; the tolerance only needs to absorb
    # MXU pass-precision differences vs. the HIGHEST-precision XLA reference.
    assert jnp.allclose(out, ref, atol=2e-2, rtol=2e-2), "mismatch vs reference"
    print("KERNEL_OK")
</pallas_src>

<mosaic_0001>
module attributes {stable_mosaic.version = 11 : i64} {
  func.func @kernel(%arg0: memref<32x128xf32, #tpu.memory_space<vmem>>, %arg1: memref<128x128xf32, #tpu.memory_space<vmem>>, %arg2: memref<1x128xf32, #tpu.memory_space<vmem>>, %arg3: memref<3x128x384xf32, #tpu.memory_space<vmem>>, %arg4: memref<3x1x384xf32, #tpu.memory_space<vmem>>, %arg5: memref<128x128xf32, #tpu.memory_space<vmem>>, %arg6: memref<1x128xf32, #tpu.memory_space<vmem>>, %arg7: memref<32x128xf32, #tpu.memory_space<vmem>>) attributes {dimension_semantics = [], scalar_prefetch = 0 : i64, scratch_operands = 0 : i64, tpu.core_type = #tpu.core_type<tc>} {
    %c0 = arith.constant 0 : index
    %c0_0 = arith.constant 0 : index
    %0 = vector.load %arg0[%c0, %c0_0] : memref<32x128xf32, #tpu.memory_space<vmem>>, vector<32x128xf32>
    %c0_1 = arith.constant 0 : index
    %c0_2 = arith.constant 0 : index
    %1 = vector.load %arg1[%c0_1, %c0_2] : memref<128x128xf32, #tpu.memory_space<vmem>>, vector<128x128xf32>
    %cst = arith.constant dense<0.000000e+00> : vector<32x128xf32>
    %2 = tpu.matmul %0, %1, %cst {dimension_numbers = #tpu.dot_dimension_numbers<[1], [0], [0], [1], [0, 0, 1, 1], [], []>} : vector<32x128xf32>, vector<128x128xf32>, vector<32x128xf32> -> vector<32x128xf32>
    %c0_3 = arith.constant 0 : index
    %c0_4 = arith.constant 0 : index
    %3 = vector.load %arg2[%c0_3, %c0_4] : memref<1x128xf32, #tpu.memory_space<vmem>>, vector<1x128xf32>
    %4 = vector.broadcast %3 : vector<1x128xf32> to vector<32x128xf32>
    %5 = arith.addf %2, %4 : vector<32x128xf32>
    %cst_5 = arith.constant 0.000000e+00 : f32
    %6 = vector.broadcast %cst_5 : f32 to vector<32x128xf32>
    %7 = arith.maximumf %5, %6 : vector<32x128xf32>
    %c0_6 = arith.constant 0 : index
    %c0_7 = arith.constant 0 : index
    %c0_8 = arith.constant 0 : index
    %8 = vector.load %arg3[%c0_6, %c0_7, %c0_8] : memref<3x128x384xf32, #tpu.memory_space<vmem>>, vector<1x128x384xf32>
    %9 = vector.shape_cast %8 : vector<1x128x384xf32> to vector<128x384xf32>
    %cst_9 = arith.constant dense<0.000000e+00> : vector<32x384xf32>
    %10 = tpu.matmul %7, %9, %cst_9 {dimension_numbers = #tpu.dot_dimension_numbers<[1], [0], [0], [1], [0, 0, 1, 1], [], []>} : vector<32x128xf32>, vector<128x384xf32>, vector<32x384xf32> -> vector<32x384xf32>
    %c0_10 = arith.constant 0 : index
    %c0_11 = arith.constant 0 : index
    %c0_12 = arith.constant 0 : index
    %11 = vector.load %arg4[%c0_10, %c0_11, %c0_12] : memref<3x1x384xf32, #tpu.memory_space<vmem>>, vector<1x1x384xf32>
    %12 = vector.shape_cast %11 : vector<1x1x384xf32> to vector<1x384xf32>
    %13 = vector.broadcast %12 : vector<1x384xf32> to vector<32x384xf32>
    %14 = arith.addf %10, %13 : vector<32x384xf32>
    %15 = vector.extract_strided_slice %14 {offsets = [0, 0], sizes = [32, 128], strides = [1, 1]} : vector<32x384xf32> to vector<32x128xf32>
    %16 = vector.extract_strided_slice %14 {offsets = [0, 128], sizes = [32, 128], strides = [1, 1]} : vector<32x384xf32> to vector<32x128xf32>
    %17 = vector.extract_strided_slice %14 {offsets = [0, 256], sizes = [32, 128], strides = [1, 1]} : vector<32x384xf32> to vector<32x128xf32>
    %18 = vector.extract_strided_slice %15 {offsets = [0, 0], sizes = [8, 128], strides = [1, 1]} : vector<32x128xf32> to vector<8x128xf32>
    %19 = vector.extract_strided_slice %16 {offsets = [0, 0], sizes = [8, 128], strides = [1, 1]} : vector<32x128xf32> to vector<8x128xf32>
    %20 = vector.extract_strided_slice %17 {offsets = [0, 0], sizes = [8, 128], strides = [1, 1]} : vector<32x128xf32> to vector<8x128xf32>
    %cst_13 = arith.constant dense<0.000000e+00> : vector<8x8xf32>
    %21 = tpu.matmul %18, %19, %cst_13 {dimension_numbers = #tpu.dot_dimension_numbers<[1], [1], [0], [0], [0, 0, 1, 0], [], []>} : vector<8x128xf32>, vector<8x128xf32>, vector<8x8xf32> -> vector<8x8xf32>
    %cst_14 = arith.constant 1.250000e-01 : f32
    %22 = vector.broadcast %cst_14 : f32 to vector<8x8xf32>
    %23 = arith.mulf %21, %22 : vector<8x8xf32>
    %cst_15 = arith.constant dense<0xFF800000> : vector<8xf32>
    %24 = vector.multi_reduction <maximumf>, %23, %cst_15 [1] : vector<8x8xf32> to vector<8xf32>
    %25 = vector.shape_cast %24 : vector<8xf32> to vector<8x1xf32>
    %26 = vector.broadcast %25 : vector<8x1xf32> to vector<8x8xf32>
    %27 = arith.subf %23, %26 : vector<8x8xf32>
    %28 = math.exp %27 : vector<8x8xf32>
    %cst_16 = arith.constant dense<0.000000e+00> : vector<8xf32>
    %29 = vector.multi_reduction <add>, %28, %cst_16 [1] : vector<8x8xf32> to vector<8xf32>
    %30 = vector.shape_cast %29 : vector<8xf32> to vector<8x1xf32>
    %31 = vector.broadcast %30 : vector<8x1xf32> to vector<8x8xf32>
    %32 = arith.divf %28, %31 : vector<8x8xf32>
    %cst_17 = arith.constant dense<0.000000e+00> : vector<8x128xf32>
    %33 = tpu.matmul %32, %20, %cst_17 {dimension_numbers = #tpu.dot_dimension_numbers<[1], [0], [0], [1], [0, 0, 1, 1], [], []>} : vector<8x8xf32>, vector<8x128xf32>, vector<8x128xf32> -> vector<8x128xf32>
    %34 = vector.extract_strided_slice %15 {offsets = [8, 0], sizes = [8, 128], strides = [1, 1]} : vector<32x128xf32> to vector<8x128xf32>
    %35 = vector.extract_strided_slice %16 {offsets = [8, 0], sizes = [8, 128], strides = [1, 1]} : vector<32x128xf32> to vector<8x128xf32>
    %36 = vector.extract_strided_slice %17 {offsets = [8, 0], sizes = [8, 128], strides = [1, 1]} : vector<32x128xf32> to vector<8x128xf32>
    %cst_18 = arith.constant dense<0.000000e+00> : vector<8x8xf32>
    %37 = tpu.matmul %34, %35, %cst_18 {dimension_numbers = #tpu.dot_dimension_numbers<[1], [1], [0], [0], [0, 0, 1, 0], [], []>} : vector<8x128xf32>, vector<8x128xf32>, vector<8x8xf32> -> vector<8x8xf32>
    %cst_19 = arith.constant 1.250000e-01 : f32
    %38 = vector.broadcast %cst_19 : f32 to vector<8x8xf32>
    %39 = arith.mulf %37, %38 : vector<8x8xf32>
    %cst_20 = arith.constant dense<0xFF800000> : vector<8xf32>
    %40 = vector.multi_reduction <maximumf>, %39, %cst_20 [1] : vector<8x8xf32> to vector<8xf32>
    %41 = vector.shape_cast %40 : vector<8xf32> to vector<8x1xf32>
    %42 = vector.broadcast %41 : vector<8x1xf32> to vector<8x8xf32>
    %43 = arith.subf %39, %42 : vector<8x8xf32>
    %44 = math.exp %43 : vector<8x8xf32>
    %cst_21 = arith.constant dense<0.000000e+00> : vector<8xf32>
    %45 = vector.multi_reduction <add>, %44, %cst_21 [1] : vector<8x8xf32> to vector<8xf32>
    %46 = vector.shape_cast %45 : vector<8xf32> to vector<8x1xf32>
    %47 = vector.broadcast %46 : vector<8x1xf32> to vector<8x8xf32>
    %48 = arith.divf %44, %47 : vector<8x8xf32>
    %cst_22 = arith.constant dense<0.000000e+00> : vector<8x128xf32>
    %49 = tpu.matmul %48, %36, %cst_22 {dimension_numbers = #tpu.dot_dimension_numbers<[1], [0], [0], [1], [0, 0, 1, 1], [], []>} : vector<8x8xf32>, vector<8x128xf32>, vector<8x128xf32> -> vector<8x128xf32>
    %50 = vector.extract_strided_slice %15 {offsets = [16, 0], sizes = [8, 128], strides = [1, 1]} : vector<32x128xf32> to vector<8x128xf32>
    %51 = vector.extract_strided_slice %16 {offsets = [16, 0], sizes = [8, 128], strides = [1, 1]} : vector<32x128xf32> to vector<8x128xf32>
    %52 = vector.extract_strided_slice %17 {offsets = [16, 0], sizes = [8, 128], strides = [1, 1]} : vector<32x128xf32> to vector<8x128xf32>
    %cst_23 = arith.constant dense<0.000000e+00> : vector<8x8xf32>
    %53 = tpu.matmul %50, %51, %cst_23 {dimension_numbers = #tpu.dot_dimension_numbers<[1], [1], [0], [0], [0, 0, 1, 0], [], []>} : vector<8x128xf32>, vector<8x128xf32>, vector<8x8xf32> -> vector<8x8xf32>
    %cst_24 = arith.constant 1.250000e-01 : f32
    %54 = vector.broadcast %cst_24 : f32 to vector<8x8xf32>
    %55 = arith.mulf %53, %54 : vector<8x8xf32>
    %cst_25 = arith.constant dense<0xFF800000> : vector<8xf32>
    %56 = vector.multi_reduction <maximumf>, %55, %cst_25 [1] : vector<8x8xf32> to vector<8xf32>
    %57 = vector.shape_cast %56 : vector<8xf32> to vector<8x1xf32>
    %58 = vector.broadcast %57 : vector<8x1xf32> to vector<8x8xf32>
    %59 = arith.subf %55, %58 : vector<8x8xf32>
    %60 = math.exp %59 : vector<8x8xf32>
    %cst_26 = arith.constant dense<0.000000e+00> : vector<8xf32>
    %61 = vector.multi_reduction <add>, %60, %cst_26 [1] : vector<8x8xf32> to vector<8xf32>
    %62 = vector.shape_cast %61 : vector<8xf32> to vector<8x1xf32>
    %63 = vector.broadcast %62 : vector<8x1xf32> to vector<8x8xf32>
    %64 = arith.divf %60, %63 : vector<8x8xf32>
    %cst_27 = arith.constant dense<0.000000e+00> : vector<8x128xf32>
    %65 = tpu.matmul %64, %52, %cst_27 {dimension_numbers = #tpu.dot_dimension_numbers<[1], [0], [0], [1], [0, 0, 1, 1], [], []>} : vector<8x8xf32>, vector<8x128xf32>, vector<8x128xf32> -> vector<8x128xf32>
    %66 = vector.extract_strided_slice %15 {offsets = [24, 0], sizes = [8, 128], strides = [1, 1]} : vector<32x128xf32> to vector<8x128xf32>
    %67 = vector.extract_strided_slice %16 {offsets = [24, 0], sizes = [8, 128], strides = [1, 1]} : vector<32x128xf32> to vector<8x128xf32>
    %68 = vector.extract_strided_slice %17 {offsets = [24, 0], sizes = [8, 128], strides = [1, 1]} : vector<32x128xf32> to vector<8x128xf32>
    %cst_28 = arith.constant dense<0.000000e+00> : vector<8x8xf32>
    %69 = tpu.matmul %66, %67, %cst_28 {dimension_numbers = #tpu.dot_dimension_numbers<[1], [1], [0], [0], [0, 0, 1, 0], [], []>} : vector<8x128xf32>, vector<8x128xf32>, vector<8x8xf32> -> vector<8x8xf32>
    %cst_29 = arith.constant 1.250000e-01 : f32
    %70 = vector.broadcast %cst_29 : f32 to vector<8x8xf32>
    %71 = arith.mulf %69, %70 : vector<8x8xf32>
    %cst_30 = arith.constant dense<0xFF800000> : vector<8xf32>
    %72 = vector.multi_reduction <maximumf>, %71, %cst_30 [1] : vector<8x8xf32> to vector<8xf32>
    %73 = vector.shape_cast %72 : vector<8xf32> to vector<8x1xf32>
    %74 = vector.broadcast %73 : vector<8x1xf32> to vector<8x8xf32>
    %75 = arith.subf %71, %74 : vector<8x8xf32>
    %76 = math.exp %75 : vector<8x8xf32>
    %cst_31 = arith.constant dense<0.000000e+00> : vector<8xf32>
    %77 = vector.multi_reduction <add>, %76, %cst_31 [1] : vector<8x8xf32> to vector<8xf32>
    %78 = vector.shape_cast %77 : vector<8xf32> to vector<8x1xf32>
    %79 = vector.broadcast %78 : vector<8x1xf32> to vector<8x8xf32>
    %80 = arith.divf %76, %79 : vector<8x8xf32>
    %cst_32 = arith.constant dense<0.000000e+00> : vector<8x128xf32>
    %81 = tpu.matmul %80, %68, %cst_32 {dimension_numbers = #tpu.dot_dimension_numbers<[1], [0], [0], [1], [0, 0, 1, 1], [], []>} : vector<8x8xf32>, vector<8x128xf32>, vector<8x128xf32> -> vector<8x128xf32>
    %82 = tpu.concatenate %33, %49, %65, %81 in 0 : vector<8x128xf32>, vector<8x128xf32>, vector<8x128xf32>, vector<8x128xf32> -> vector<32x128xf32>
    %83 = arith.addf %82, %7 : vector<32x128xf32>
    %c1 = arith.constant 1 : index
    %c0_33 = arith.constant 0 : index
    %c0_34 = arith.constant 0 : index
    %84 = vector.load %arg3[%c1, %c0_33, %c0_34] : memref<3x128x384xf32, #tpu.memory_space<vmem>>, vector<1x128x384xf32>
    %85 = vector.shape_cast %84 : vector<1x128x384xf32> to vector<128x384xf32>
    %cst_35 = arith.constant dense<0.000000e+00> : vector<32x384xf32>
    %86 = tpu.matmul %83, %85, %cst_35 {dimension_numbers = #tpu.dot_dimension_numbers<[1], [0], [0], [1], [0, 0, 1, 1], [], []>} : vector<32x128xf32>, vector<128x384xf32>, vector<32x384xf32> -> vector<32x384xf32>
    %c1_36 = arith.constant 1 : index
    %c0_37 = arith.constant 0 : index
    %c0_38 = arith.constant 0 : index
    %87 = vector.load %arg4[%c1_36, %c0_37, %c0_38] : memref<3x1x384xf32, #tpu.memory_space<vmem>>, vector<1x1x384xf32>
    %88 = vector.shape_cast %87 : vector<1x1x384xf32> to vector<1x384xf32>
    %89 = vector.broadcast %88 : vector<1x384xf32> to vector<32x384xf32>
    %90 = arith.addf %86, %89 : vector<32x384xf32>
    %91 = vector.extract_strided_slice %90 {offsets = [0, 0], sizes = [32, 128], strides = [1, 1]} : vector<32x384xf32> to vector<32x128xf32>
    %92 = vector.extract_strided_slice %90 {offsets = [0, 128], sizes = [32, 128], strides = [1, 1]} : vector<32x384xf32> to vector<32x128xf32>
    %93 = vector.extract_strided_slice %90 {offsets = [0, 256], sizes = [32, 128], strides = [1, 1]} : vector<32x384xf32> to vector<32x128xf32>
    %94 = vector.extract_strided_slice %91 {offsets = [0, 0], sizes = [8, 128], strides = [1, 1]} : vector<32x128xf32> to vector<8x128xf32>
    %95 = vector.extract_strided_slice %92 {offsets = [0, 0], sizes = [8, 128], strides = [1, 1]} : vector<32x128xf32> to vector<8x128xf32>
    %96 = vector.extract_strided_slice %93 {offsets = [0, 0], sizes = [8, 128], strides = [1, 1]} : vector<32x128xf32> to vector<8x128xf32>
    %cst_39 = arith.constant dense<0.000000e+00> : vector<8x8xf32>
    %97 = tpu.matmul %94, %95, %cst_39 {dimension_numbers = #tpu.dot_dimension_numbers<[1], [1], [0], [0], [0, 0, 1, 0], [], []>} : vector<8x128xf32>, vector<8x128xf32>, vector<8x8xf32> -> vector<8x8xf32>
    %cst_40 = arith.constant 1.250000e-01 : f32
    %98 = vector.broadcast %cst_40 : f32 to vector<8x8xf32>
    %99 = arith.mulf %97, %98 : vector<8x8xf32>
    %cst_41 = arith.constant dense<0xFF800000> : vector<8xf32>
    %100 = vector.multi_reduction <maximumf>, %99, %cst_41 [1] : vector<8x8xf32> to vector<8xf32>
    %101 = vector.shape_cast %100 : vector<8xf32> to vector<8x1xf32>
    %102 = vector.broadcast %101 : vector<8x1xf32> to vector<8x8xf32>
    %103 = arith.subf %99, %102 : vector<8x8xf32>
    %104 = math.exp %103 : vector<8x8xf32>
    %cst_42 = arith.constant dense<0.000000e+00> : vector<8xf32>
    %105 = vector.multi_reduction <add>, %104, %cst_42 [1] : vector<8x8xf32> to vector<8xf32>
    %106 = vector.shape_cast %105 : vector<8xf32> to vector<8x1xf32>
    %107 = vector.broadcast %106 : vector<8x1xf32> to vector<8x8xf32>
    %108 = arith.divf %104, %107 : vector<8x8xf32>
    %cst_43 = arith.constant dense<0.000000e+00> : vector<8x128xf32>
    %109 = tpu.matmul %108, %96, %cst_43 {dimension_numbers = #tpu.dot_dimension_numbers<[1], [0], [0], [1], [0, 0, 1, 1], [], []>} : vector<8x8xf32>, vector<8x128xf32>, vector<8x128xf32> -> vector<8x128xf32>
    %110 = vector.extract_strided_slice %91 {offsets = [8, 0], sizes = [8, 128], strides = [1, 1]} : vector<32x128xf32> to vector<8x128xf32>
    %111 = vector.extract_strided_slice %92 {offsets = [8, 0], sizes = [8, 128], strides = [1, 1]} : vector<32x128xf32> to vector<8x128xf32>
    %112 = vector.extract_strided_slice %93 {offsets = [8, 0], sizes = [8, 128], strides = [1, 1]} : vector<32x128xf32> to vector<8x128xf32>
    %cst_44 = arith.constant dense<0.000000e+00> : vector<8x8xf32>
    %113 = tpu.matmul %110, %111, %cst_44 {dimension_numbers = #tpu.dot_dimension_numbers<[1], [1], [0], [0], [0, 0, 1, 0], [], []>} : vector<8x128xf32>, vector<8x128xf32>, vector<8x8xf32> -> vector<8x8xf32>
    %cst_45 = arith.constant 1.250000e-01 : f32
    %114 = vector.broadcast %cst_45 : f32 to vector<8x8xf32>
    %115 = arith.mulf %113, %114 : vector<8x8xf32>
    %cst_46 = arith.constant dense<0xFF800000> : vector<8xf32>
    %116 = vector.multi_reduction <maximumf>, %115, %cst_46 [1] : vector<8x8xf32> to vector<8xf32>
    %117 = vector.shape_cast %116 : vector<8xf32> to vector<8x1xf32>
    %118 = vector.broadcast %117 : vector<8x1xf32> to vector<8x8xf32>
    %119 = arith.subf %115, %118 : vector<8x8xf32>
    %120 = math.exp %119 : vector<8x8xf32>
    %cst_47 = arith.constant dense<0.000000e+00> : vector<8xf32>
    %121 = vector.multi_reduction <add>, %120, %cst_47 [1] : vector<8x8xf32> to vector<8xf32>
    %122 = vector.shape_cast %121 : vector<8xf32> to vector<8x1xf32>
    %123 = vector.broadcast %122 : vector<8x1xf32> to vector<8x8xf32>
    %124 = arith.divf %120, %123 : vector<8x8xf32>
    %cst_48 = arith.constant dense<0.000000e+00> : vector<8x128xf32>
    %125 = tpu.matmul %124, %112, %cst_48 {dimension_numbers = #tpu.dot_dimension_numbers<[1], [0], [0], [1], [0, 0, 1, 1], [], []>} : vector<8x8xf32>, vector<8x128xf32>, vector<8x128xf32> -> vector<8x128xf32>
    %126 = vector.extract_strided_slice %91 {offsets = [16, 0], sizes = [8, 128], strides = [1, 1]} : vector<32x128xf32> to vector<8x128xf32>
    %127 = vector.extract_strided_slice %92 {offsets = [16, 0], sizes = [8, 128], strides = [1, 1]} : vector<32x128xf32> to vector<8x128xf32>
    %128 = vector.extract_strided_slice %93 {offsets = [16, 0], sizes = [8, 128], strides = [1, 1]} : vector<32x128xf32> to vector<8x128xf32>
    %cst_49 = arith.constant dense<0.000000e+00> : vector<8x8xf32>
    %129 = tpu.matmul %126, %127, %cst_49 {dimension_numbers = #tpu.dot_dimension_numbers<[1], [1], [0], [0], [0, 0, 1, 0], [], []>} : vector<8x128xf32>, vector<8x128xf32>, vector<8x8xf32> -> vector<8x8xf32>
    %cst_50 = arith.constant 1.250000e-01 : f32
    %130 = vector.broadcast %cst_50 : f32 to vector<8x8xf32>
    %131 = arith.mulf %129, %130 : vector<8x8xf32>
    %cst_51 = arith.constant dense<0xFF800000> : vector<8xf32>
    %132 = vector.multi_reduction <maximumf>, %131, %cst_51 [1] : vector<8x8xf32> to vector<8xf32>
    %133 = vector.shape_cast %132 : vector<8xf32> to vector<8x1xf32>
    %134 = vector.broadcast %133 : vector<8x1xf32> to vector<8x8xf32>
    %135 = arith.subf %131, %134 : vector<8x8xf32>
    %136 = math.exp %135 : vector<8x8xf32>
    %cst_52 = arith.constant dense<0.000000e+00> : vector<8xf32>
    %137 = vector.multi_reduction <add>, %136, %cst_52 [1] : vector<8x8xf32> to vector<8xf32>
    %138 = vector.shape_cast %137 : vector<8xf32> to vector<8x1xf32>
    %139 = vector.broadcast %138 : vector<8x1xf32> to vector<8x8xf32>
    %140 = arith.divf %136, %139 : vector<8x8xf32>
    %cst_53 = arith.constant dense<0.000000e+00> : vector<8x128xf32>
    %141 = tpu.matmul %140, %128, %cst_53 {dimension_numbers = #tpu.dot_dimension_numbers<[1], [0], [0], [1], [0, 0, 1, 1], [], []>} : vector<8x8xf32>, vector<8x128xf32>, vector<8x128xf32> -> vector<8x128xf32>
    %142 = vector.extract_strided_slice %91 {offsets = [24, 0], sizes = [8, 128], strides = [1, 1]} : vector<32x128xf32> to vector<8x128xf32>
    %143 = vector.extract_strided_slice %92 {offsets = [24, 0], sizes = [8, 128], strides = [1, 1]} : vector<32x128xf32> to vector<8x128xf32>
    %144 = vector.extract_strided_slice %93 {offsets = [24, 0], sizes = [8, 128], strides = [1, 1]} : vector<32x128xf32> to vector<8x128xf32>
    %cst_54 = arith.constant dense<0.000000e+00> : vector<8x8xf32>
    %145 = tpu.matmul %142, %143, %cst_54 {dimension_numbers = #tpu.dot_dimension_numbers<[1], [1], [0], [0], [0, 0, 1, 0], [], []>} : vector<8x128xf32>, vector<8x128xf32>, vector<8x8xf32> -> vector<8x8xf32>
    %cst_55 = arith.constant 1.250000e-01 : f32
    %146 = vector.broadcast %cst_55 : f32 to vector<8x8xf32>
    %147 = arith.mulf %145, %146 : vector<8x8xf32>
    %cst_56 = arith.constant dense<0xFF800000> : vector<8xf32>
    %148 = vector.multi_reduction <maximumf>, %147, %cst_56 [1] : vector<8x8xf32> to vector<8xf32>
    %149 = vector.shape_cast %148 : vector<8xf32> to vector<8x1xf32>
    %150 = vector.broadcast %149 : vector<8x1xf32> to vector<8x8xf32>
    %151 = arith.subf %147, %150 : vector<8x8xf32>
    %152 = math.exp %151 : vector<8x8xf32>
    %cst_57 = arith.constant dense<0.000000e+00> : vector<8xf32>
    %153 = vector.multi_reduction <add>, %152, %cst_57 [1] : vector<8x8xf32> to vector<8xf32>
    %154 = vector.shape_cast %153 : vector<8xf32> to vector<8x1xf32>
    %155 = vector.broadcast %154 : vector<8x1xf32> to vector<8x8xf32>
    %156 = arith.divf %152, %155 : vector<8x8xf32>
    %cst_58 = arith.constant dense<0.000000e+00> : vector<8x128xf32>
    %157 = tpu.matmul %156, %144, %cst_58 {dimension_numbers = #tpu.dot_dimension_numbers<[1], [0], [0], [1], [0, 0, 1, 1], [], []>} : vector<8x8xf32>, vector<8x128xf32>, vector<8x128xf32> -> vector<8x128xf32>
    %158 = tpu.concatenate %109, %125, %141, %157 in 0 : vector<8x128xf32>, vector<8x128xf32>, vector<8x128xf32>, vector<8x128xf32> -> vector<32x128xf32>
    %159 = arith.addf %158, %83 : vector<32x128xf32>
    %c2 = arith.constant 2 : index
    %c0_59 = arith.constant 0 : index
    %c0_60 = arith.constant 0 : index
    %160 = vector.load %arg3[%c2, %c0_59, %c0_60] : memref<3x128x384xf32, #tpu.memory_space<vmem>>, vector<1x128x384xf32>
    %161 = vector.shape_cast %160 : vector<1x128x384xf32> to vector<128x384xf32>
    %cst_61 = arith.constant dense<0.000000e+00> : vector<32x384xf32>
    %162 = tpu.matmul %159, %161, %cst_61 {dimension_numbers = #tpu.dot_dimension_numbers<[1], [0], [0], [1], [0, 0, 1, 1], [], []>} : vector<32x128xf32>, vector<128x384xf32>, vector<32x384xf32> -> vector<32x384xf32>
    %c2_62 = arith.constant 2 : index
    %c0_63 = arith.constant 0 : index
    %c0_64 = arith.constant 0 : index
    %163 = vector.load %arg4[%c2_62, %c0_63, %c0_64] : memref<3x1x384xf32, #tpu.memory_space<vmem>>, vector<1x1x384xf32>
    %164 = vector.shape_cast %163 : vector<1x1x384xf32> to vector<1x384xf32>
    %165 = vector.broadcast %164 : vector<1x384xf32> to vector<32x384xf32>
    %166 = arith.addf %162, %165 : vector<32x384xf32>
    %167 = vector.extract_strided_slice %166 {offsets = [0, 0], sizes = [32, 128], strides = [1, 1]} : vector<32x384xf32> to vector<32x128xf32>
    %168 = vector.extract_strided_slice %166 {offsets = [0, 128], sizes = [32, 128], strides = [1, 1]} : vector<32x384xf32> to vector<32x128xf32>
    %169 = vector.extract_strided_slice %166 {offsets = [0, 256], sizes = [32, 128], strides = [1, 1]} : vector<32x384xf32> to vector<32x128xf32>
    %170 = vector.extract_strided_slice %167 {offsets = [0, 0], sizes = [8, 128], strides = [1, 1]} : vector<32x128xf32> to vector<8x128xf32>
    %171 = vector.extract_strided_slice %168 {offsets = [0, 0], sizes = [8, 128], strides = [1, 1]} : vector<32x128xf32> to vector<8x128xf32>
    %172 = vector.extract_strided_slice %169 {offsets = [0, 0], sizes = [8, 128], strides = [1, 1]} : vector<32x128xf32> to vector<8x128xf32>
    %cst_65 = arith.constant dense<0.000000e+00> : vector<8x8xf32>
    %173 = tpu.matmul %170, %171, %cst_65 {dimension_numbers = #tpu.dot_dimension_numbers<[1], [1], [0], [0], [0, 0, 1, 0], [], []>} : vector<8x128xf32>, vector<8x128xf32>, vector<8x8xf32> -> vector<8x8xf32>
    %cst_66 = arith.constant 1.250000e-01 : f32
    %174 = vector.broadcast %cst_66 : f32 to vector<8x8xf32>
    %175 = arith.mulf %173, %174 : vector<8x8xf32>
    %cst_67 = arith.constant dense<0xFF800000> : vector<8xf32>
    %176 = vector.multi_reduction <maximumf>, %175, %cst_67 [1] : vector<8x8xf32> to vector<8xf32>
    %177 = vector.shape_cast %176 : vector<8xf32> to vector<8x1xf32>
    %178 = vector.broadcast %177 : vector<8x1xf32> to vector<8x8xf32>
    %179 = arith.subf %175, %178 : vector<8x8xf32>
    %180 = math.exp %179 : vector<8x8xf32>
    %cst_68 = arith.constant dense<0.000000e+00> : vector<8xf32>
    %181 = vector.multi_reduction <add>, %180, %cst_68 [1] : vector<8x8xf32> to vector<8xf32>
    %182 = vector.shape_cast %181 : vector<8xf32> to vector<8x1xf32>
    %183 = vector.broadcast %182 : vector<8x1xf32> to vector<8x8xf32>
    %184 = arith.divf %180, %183 : vector<8x8xf32>
    %cst_69 = arith.constant dense<0.000000e+00> : vector<8x128xf32>
    %185 = tpu.matmul %184, %172, %cst_69 {dimension_numbers = #tpu.dot_dimension_numbers<[1], [0], [0], [1], [0, 0, 1, 1], [], []>} : vector<8x8xf32>, vector<8x128xf32>, vector<8x128xf32> -> vector<8x128xf32>
    %186 = vector.extract_strided_slice %167 {offsets = [8, 0], sizes = [8, 128], strides = [1, 1]} : vector<32x128xf32> to vector<8x128xf32>
    %187 = vector.extract_strided_slice %168 {offsets = [8, 0], sizes = [8, 128], strides = [1, 1]} : vector<32x128xf32> to vector<8x128xf32>
    %188 = vector.extract_strided_slice %169 {offsets = [8, 0], sizes = [8, 128], strides = [1, 1]} : vector<32x128xf32> to vector<8x128xf32>
    %cst_70 = arith.constant dense<0.000000e+00> : vector<8x8xf32>
    %189 = tpu.matmul %186, %187, %cst_70 {dimension_numbers = #tpu.dot_dimension_numbers<[1], [1], [0], [0], [0, 0, 1, 0], [], []>} : vector<8x128xf32>, vector<8x128xf32>, vector<8x8xf32> -> vector<8x8xf32>
    %cst_71 = arith.constant 1.250000e-01 : f32
    %190 = vector.broadcast %cst_71 : f32 to vector<8x8xf32>
    %191 = arith.mulf %189, %190 : vector<8x8xf32>
    %cst_72 = arith.constant dense<0xFF800000> : vector<8xf32>
    %192 = vector.multi_reduction <maximumf>, %191, %cst_72 [1] : vector<8x8xf32> to vector<8xf32>
    %193 = vector.shape_cast %192 : vector<8xf32> to vector<8x1xf32>
    %194 = vector.broadcast %193 : vector<8x1xf32> to vector<8x8xf32>
    %195 = arith.subf %191, %194 : vector<8x8xf32>
    %196 = math.exp %195 : vector<8x8xf32>
    %cst_73 = arith.constant dense<0.000000e+00> : vector<8xf32>
    %197 = vector.multi_reduction <add>, %196, %cst_73 [1] : vector<8x8xf32> to vector<8xf32>
    %198 = vector.shape_cast %197 : vector<8xf32> to vector<8x1xf32>
    %199 = vector.broadcast %198 : vector<8x1xf32> to vector<8x8xf32>
    %200 = arith.divf %196, %199 : vector<8x8xf32>
    %cst_74 = arith.constant dense<0.000000e+00> : vector<8x128xf32>
    %201 = tpu.matmul %200, %188, %cst_74 {dimension_numbers = #tpu.dot_dimension_numbers<[1], [0], [0], [1], [0, 0, 1, 1], [], []>} : vector<8x8xf32>, vector<8x128xf32>, vector<8x128xf32> -> vector<8x128xf32>
    %202 = vector.extract_strided_slice %167 {offsets = [16, 0], sizes = [8, 128], strides = [1, 1]} : vector<32x128xf32> to vector<8x128xf32>
    %203 = vector.extract_strided_slice %168 {offsets = [16, 0], sizes = [8, 128], strides = [1, 1]} : vector<32x128xf32> to vector<8x128xf32>
    %204 = vector.extract_strided_slice %169 {offsets = [16, 0], sizes = [8, 128], strides = [1, 1]} : vector<32x128xf32> to vector<8x128xf32>
    %cst_75 = arith.constant dense<0.000000e+00> : vector<8x8xf32>
    %205 = tpu.matmul %202, %203, %cst_75 {dimension_numbers = #tpu.dot_dimension_numbers<[1], [1], [0], [0], [0, 0, 1, 0], [], []>} : vector<8x128xf32>, vector<8x128xf32>, vector<8x8xf32> -> vector<8x8xf32>
    %cst_76 = arith.constant 1.250000e-01 : f32
    %206 = vector.broadcast %cst_76 : f32 to vector<8x8xf32>
    %207 = arith.mulf %205, %206 : vector<8x8xf32>
    %cst_77 = arith.constant dense<0xFF800000> : vector<8xf32>
    %208 = vector.multi_reduction <maximumf>, %207, %cst_77 [1] : vector<8x8xf32> to vector<8xf32>
    %209 = vector.shape_cast %208 : vector<8xf32> to vector<8x1xf32>
    %210 = vector.broadcast %209 : vector<8x1xf32> to vector<8x8xf32>
    %211 = arith.subf %207, %210 : vector<8x8xf32>
    %212 = math.exp %211 : vector<8x8xf32>
    %cst_78 = arith.constant dense<0.000000e+00> : vector<8xf32>
    %213 = vector.multi_reduction <add>, %212, %cst_78 [1] : vector<8x8xf32> to vector<8xf32>
    %214 = vector.shape_cast %213 : vector<8xf32> to vector<8x1xf32>
    %215 = vector.broadcast %214 : vector<8x1xf32> to vector<8x8xf32>
    %216 = arith.divf %212, %215 : vector<8x8xf32>
    %cst_79 = arith.constant dense<0.000000e+00> : vector<8x128xf32>
    %217 = tpu.matmul %216, %204, %cst_79 {dimension_numbers = #tpu.dot_dimension_numbers<[1], [0], [0], [1], [0, 0, 1, 1], [], []>} : vector<8x8xf32>, vector<8x128xf32>, vector<8x128xf32> -> vector<8x128xf32>
    %218 = vector.extract_strided_slice %167 {offsets = [24, 0], sizes = [8, 128], strides = [1, 1]} : vector<32x128xf32> to vector<8x128xf32>
    %219 = vector.extract_strided_slice %168 {offsets = [24, 0], sizes = [8, 128], strides = [1, 1]} : vector<32x128xf32> to vector<8x128xf32>
    %220 = vector.extract_strided_slice %169 {offsets = [24, 0], sizes = [8, 128], strides = [1, 1]} : vector<32x128xf32> to vector<8x128xf32>
    %cst_80 = arith.constant dense<0.000000e+00> : vector<8x8xf32>
    %221 = tpu.matmul %218, %219, %cst_80 {dimension_numbers = #tpu.dot_dimension_numbers<[1], [1], [0], [0], [0, 0, 1, 0], [], []>} : vector<8x128xf32>, vector<8x128xf32>, vector<8x8xf32> -> vector<8x8xf32>
    %cst_81 = arith.constant 1.250000e-01 : f32
    %222 = vector.broadcast %cst_81 : f32 to vector<8x8xf32>
    %223 = arith.mulf %221, %222 : vector<8x8xf32>
    %cst_82 = arith.constant dense<0xFF800000> : vector<8xf32>
    %224 = vector.multi_reduction <maximumf>, %223, %cst_82 [1] : vector<8x8xf32> to vector<8xf32>
    %225 = vector.shape_cast %224 : vector<8xf32> to vector<8x1xf32>
    %226 = vector.broadcast %225 : vector<8x1xf32> to vector<8x8xf32>
    %227 = arith.subf %223, %226 : vector<8x8xf32>
    %228 = math.exp %227 : vector<8x8xf32>
    %cst_83 = arith.constant dense<0.000000e+00> : vector<8xf32>
    %229 = vector.multi_reduction <add>, %228, %cst_83 [1] : vector<8x8xf32> to vector<8xf32>
    %230 = vector.shape_cast %229 : vector<8xf32> to vector<8x1xf32>
    %231 = vector.broadcast %230 : vector<8x1xf32> to vector<8x8xf32>
    %232 = arith.divf %228, %231 : vector<8x8xf32>
    %cst_84 = arith.constant dense<0.000000e+00> : vector<8x128xf32>
    %233 = tpu.matmul %232, %220, %cst_84 {dimension_numbers = #tpu.dot_dimension_numbers<[1], [0], [0], [1], [0, 0, 1, 1], [], []>} : vector<8x8xf32>, vector<8x128xf32>, vector<8x128xf32> -> vector<8x128xf32>
    %234 = tpu.concatenate %185, %201, %217, %233 in 0 : vector<8x128xf32>, vector<8x128xf32>, vector<8x128xf32>, vector<8x128xf32> -> vector<32x128xf32>
    %235 = arith.addf %234, %159 : vector<32x128xf32>
    %cst_85 = arith.constant 0.000000e+00 : f32
    %236 = vector.broadcast %cst_85 : f32 to vector<32x128xf32>
    %237 = arith.maximumf %235, %236 : vector<32x128xf32>
    %c0_86 = arith.constant 0 : index
    %c0_87 = arith.constant 0 : index
    %238 = vector.load %arg5[%c0_86, %c0_87] : memref<128x128xf32, #tpu.memory_space<vmem>>, vector<128x128xf32>
    %cst_88 = arith.constant dense<0.000000e+00> : vector<32x128xf32>
    %239 = tpu.matmul %237, %238, %cst_88 {dimension_numbers = #tpu.dot_dimension_numbers<[1], [0], [0], [1], [0, 0, 1, 1], [], []>} : vector<32x128xf32>, vector<128x128xf32>, vector<32x128xf32> -> vector<32x128xf32>
    %c0_89 = arith.constant 0 : index
    %c0_90 = arith.constant 0 : index
    %240 = vector.load %arg6[%c0_89, %c0_90] : memref<1x128xf32, #tpu.memory_space<vmem>>, vector<1x128xf32>
    %241 = vector.broadcast %240 : vector<1x128xf32> to vector<32x128xf32>
    %242 = arith.addf %239, %241 : vector<32x128xf32>
    %c0_91 = arith.constant 0 : index
    %c0_92 = arith.constant 0 : index
    %243 = vector.load %arg7[%c0_91, %c0_92] : memref<32x128xf32, #tpu.memory_space<vmem>>, vector<32x128xf32>
    tpu.vector_store %arg7[%c0_91, %c0_92], %242 {strides = array<i32>} : memref<32x128xf32, #tpu.memory_space<vmem>>, vector<32x128xf32>,
    return
  }
}

</mosaic_0001>

<bundles_post_ra>
// kernel: tpu_custom_call.1
= control target key start
LH: loop header
LB: loop body
LE: loop exit
PB: predicated region body
PF: predicated region fallthrough
CT: control target
= control target key end

     0   :  { %12 = vsyncpa [#allocation3], 0  ;;  %s3959_s0 = inlined_call_operand.hbm [shape: f32[32,128], index: 0, kind: input, shape index: {}]   ;;  %s3960_s1 = inlined_call_operand.hbm [shape: f32[128,128], index: 1, kind: input, shape index: {}]   ;;  %s3961_s2 = inlined_call_operand.vmem [shape: f32[1,128], index: 2, kind: input, shape index: {}]   ;;  %s3962_s3 = inlined_call_operand.hbm [shape: f32[3,128,384], index: 3, kind: input, shape index: {}]   ;;  %s3963_s4 = inlined_call_operand.hbm [shape: f32[3,1,384], index: 4, kind: input, shape index: {}]   ;;  %s3964_s5 = inlined_call_operand.hbm [shape: f32[128,128], index: 5, kind: input, shape index: {}]   ;;  %s3965_s6 = inlined_call_operand.vmem [shape: f32[1,128], index: 6, kind: input, shape index: {}]   ;;  %s3966_s7 = inlined_call_operand.hbm [shape: f32[32,128], index: 7, kind: output, shape index: {}]  }
   0x1   :  { %13 = vsyncpa [#allocation6], 0 }
   0x2   :  { %14 = vsyncpa [#allocation9], 0 }
   0x3   :  { %15 = vsyncpa [#allocation4], 0  ;;  %s3602_s24 = smov [#allocation5]   ;;  %s3603_s26 = smov [#allocation8]  }
   0x4   :  { %s33_s25 = sshll.u32 %s3602_s24, 4  ;;  %s59_s27 = sshll.u32 %s3603_s26, 4  ;;  %s34_s25 = int_to_ptr.vmem [resolvable:$true] %s33_s25  ;;  %s60_s27 = int_to_ptr.vmem [resolvable:$true] %s59_s27 }
   0x5   :  { %s3482_s28 = scalar_lea.vmem %s34_s25, 2048  ;;  %p3487_p1 = scmp.lt.s32.totalorder %s34_s25, %s34_s25 }
   0x6   :  { %p3483_p0 = scmp.ne.s32.totalorder %s34_s25, %s3482_s28  ;;  %p3488_p2 = scmp.lt.s32.totalorder %s3482_s28, %s3482_s28 }
   0x8   :  { %p3489_p3 = por %p3488_p2, %p3487_p1 }
   0xa   :  { %p3490_p4 = pnand %p3489_p3, %p3483_p0 }
   0xc   :  { %3493 = shalt.err (!%p3490_p4)
}
   0xd   :  { %s3604_s29 = smov 128   ;;  %s3605_s30 = smov 8  }
   0xe   :  { %39 = dma.hbm_to_vmem [thread:$0]  %s3960_s1, 2048, %s34_s25, [#allocation6], %s3604_s29, %s3604_s29, %s3605_s30  }
   0xf   :  { %s3502_s10 = scalar_lea.vmem %s60_s27, 144  ;;  %s3506_s11 = scalar_lea.vmem %s60_s27, 160 }
  0x10   :  { %p3503_p5 = scmp.ne.s32.totalorder %s60_s27, %s3502_s10  ;;  %p3507_p6 = scmp.lt.s32.totalorder %s60_s27, %s60_s27 }
  0x11   :  { %p3508_p7 = scmp.lt.s32.totalorder %s3506_s11, %s3502_s10 }
  0x13   :  { %p3509_p8 = por %p3508_p7, %p3507_p6 }
  0x15   :  { %p3510_p9 = pnand %p3509_p8, %p3503_p5 }
  0x17   :  { %3513 = shalt.err (!%p3510_p9)
}
  0x18   :  { %s3606_s12 = smov 48   ;;  %s3607_s13 = smov 3  }
  0x19   :  { %65 = dma.hbm_to_vmem [thread:$0]  %s3963_s4, 144, %s60_s27, [#allocation9], %s3606_s12, %s3606_s12, %s3607_s13  }
  0x1a   :  { %s3608_s16 = smov [#allocation2]   ;;  %s3609_s18 = smov [#allocation7]  }
  0x1b   :  { %s21_s17 = sshll.u32 %s3608_s16, 4  ;;  %s47_s19 = sshll.u32 %s3609_s18, 4  ;;  %s22_s17 = int_to_ptr.vmem [resolvable:$true] %s21_s17  ;;  %s48_s19 = int_to_ptr.vmem [resolvable:$true] %s47_s19 }
  0x1c   :  { %s3522_s1 = scalar_lea.vmem %s22_s17, 512  ;;  %p3527_p11 = scmp.lt.s32.totalorder %s22_s17, %s22_s17 }
  0x1d   :  { %p3523_p10 = scmp.ne.s32.totalorder %s22_s17, %s3522_s1  ;;  %p3528_p12 = scmp.lt.s32.totalorder %s3522_s1, %s3522_s1 }
  0x1f   :  { %p3529_p13 = por %p3528_p12, %p3527_p11 }
  0x21   :  { %p3530_p0 = pnand %p3529_p13, %p3523_p10 }
  0x23   :  { %3533 = shalt.err (!%p3530_p0)
}
  0x24   :  { %27 = dma.hbm_to_vmem [thread:$0]  %s3959_s0, 512, %s22_s17, [#allocation3], %s3604_s29, %s3604_s29, %s3605_s30  }
  0x25   :  { %s3542_s4 = scalar_lea.vmem %s48_s19, 18432  ;;  %p3547_p2 = scmp.lt.s32.totalorder %s48_s19, %s48_s19 }
  0x26   :  { %p3543_p1 = scmp.ne.s32.totalorder %s48_s19, %s3542_s4  ;;  %p3548_p3 = scmp.lt.s32.totalorder %s3542_s4, %s3542_s4 }
  0x28   :  { %p3549_p4 = por %p3548_p3, %p3547_p2 }
  0x2a   :  { %p3550_p5 = pnand %p3549_p4, %p3543_p1 }
  0x2c   :  { %3553 = shalt.err (!%p3550_p5)
}
  0x2d   :  { %s3610_s22 = smov 384   ;;  %s3611_s23 = smov 24  }
  0x2e   :  { %53 = dma.hbm_to_vmem [thread:$0]  %s3962_s3, 18432, %s48_s19, [#allocation6], %s3610_s22, %s3610_s22, %s3611_s23  }
  0x2f   :  { %s3612_s26 = smov [#allocation10]  }
  0x30   :  { %s71_s27 = sshll.u32 %s3612_s26, 4  ;;  %s72_s27 = int_to_ptr.vmem [resolvable:$true] %s71_s27 }
  0x31   :  { %s3562_s28 = scalar_lea.vmem %s72_s27, 2048  ;;  %p3567_p7 = scmp.lt.s32.totalorder %s72_s27, %s72_s27 }
  0x32   :  { %p3563_p6 = scmp.ne.s32.totalorder %s72_s27, %s3562_s28  ;;  %p3568_p8 = scmp.lt.s32.totalorder %s3562_s28, %s3562_s28 }
  0x34   :  { %p3569_p9 = por %p3568_p8, %p3567_p7 }
  0x36   :  { %p3570_p10 = pnand %p3569_p9, %p3563_p6 }
  0x38   :  { %3573 = shalt.err (!%p3570_p10)
}
  0x39   :  { %77 = dma.hbm_to_vmem [thread:$0]  %s3964_s5, 2048, %s72_s27, [#allocation9], %s3604_s29, %s3604_s29, %s3605_s30  }
  0x3a   :  { %3594 = dma.done.wait [#allocation3], 512  }
  0x3b   :  { %3595 = vsyncadd [#allocation3], 4294966784 }
  0x3c   :  { %3596 = dma.done.wait [#allocation6], 20480  }
  0x3d   :  { %3597 = vsyncadd [#allocation6], 4294946816 }
  0x3e   :  { %3598 = dma.done.wait [#allocation9], 2192  }
  0x3f   :  { %3599 = vsyncadd [#allocation9], 4294965104  ;;  %v114_v0 = vld [vmem:[#allocation5 + $0x78] sm:$0xff]  ;;  %v113_v1 = vld [vmem:[#allocation5 + $0x70] sm:$0xff]  ;;  %v3613_v53 = vmov 0.0   ;;  %vm3614_vm0 = vmmov 0  }
  0x40   :  { %3102 = vmatprep.subr.mxu0 %v114_v0  ;;  %v112_v2 = vld [vmem:[#allocation5 + $0x68] sm:$0xff]  ;;  %v111_v3 = vld [vmem:[#allocation5 + $0x60] sm:$0xff]  ;;  %v110_v5 = vld [vmem:[#allocation5 + $0x58] sm:$0xff]  ;;  %340 = vmatprep.mubr.f32.mxu1 %v3613_v53  ;;  %vm521_vm1 = vcmask 64512   ;;  %s3615_s10 = smov [#allocation11]  }
  0x41   :  { %3103 = vmatpush3.msra.mxu0 %v114_v0  ;;  %v95_v4 = vld [vmem:[#allocation2] sm:$0xff]  ;;  %v257_v6 = vld [vmem:[#allocation7 + $0x170] sm:$0xff]  ;;  %v256_v7 = vld [vmem:[#allocation7 + $0x168] sm:$0xff]  ;;  %s2926_s11 = sshll.u32 %s3615_s10, 4  ;;  %s2927_s11 = int_to_ptr.vmem [resolvable:$true] %s2926_s11 }
  0x42   :  { %3104 = vmatprep.subr.mxu0 %v113_v1  ;;  %3134 = vmatprep.mubr.f32.mxu0 %v95_v4  ;;  %v254_v8 = vld [vmem:[#allocation7 + $0x158] sm:$0xff]  ;;  %v253_v9 = vld [vmem:[#allocation7 + $0x150] sm:$0xff]  ;;  %v251_v11 = vld [vmem:[#allocation7 + $0x140] sm:$0xff]  ;;  %s3574_s12 = scalar_lea.vmem %s2927_s11, 512  ;;  %p3579_p12 = scmp.lt.s32.totalorder %s2927_s11, %s2927_s11 }
  0x43   :  { %3105 = vmatpush3.msra.mxu0 %v113_v1  ;;  %276 = vmatprep.subr.mxu1 %v257_v6  ;;  %v109_v10 = vld [vmem:[#allocation5 + $0x50] sm:$0xff]  ;;  %v250_v12 = vld [vmem:[#allocation7 + $0x138] sm:$0xff]  ;;  %v108_v13 = vld [vmem:[#allocation5 + $0x48] sm:$0xff]  ;;  %p3575_p11 = scmp.ne.s32.totalorder %s2927_s11, %s3574_s12  ;;  %p3580_p13 = scmp.lt.s32.totalorder %s3574_s12, %s3574_s12 }
  0x44   :  { %3106 = vmatprep.subr.mxu0 %v112_v2  ;;  %277 = vmatpush1.msra.mxu1 %v256_v7  ;;  %v248_v14 = vld [vmem:[#allocation7 + $0x128] sm:$0xff]  ;;  %v247_v15 = vld [vmem:[#allocation7 + $0x120] sm:$0xff]  ;;  %v245_v17 = vld [vmem:[#allocation7 + $0x110] sm:$0xff] }
  0x45   :  { %3107 = vmatpush3.msra.mxu0 %v112_v2  ;;  %278 = vmatprep.subr.mxu1 %v254_v8  ;;  %v107_v16 = vld [vmem:[#allocation5 + $0x40] sm:$0xff]  ;;  %v244_v18 = vld [vmem:[#allocation7 + $0x108] sm:$0xff]  ;;  %v106_v19 = vld [vmem:[#allocation5 + $0x38] sm:$0xff]  ;;  %p3581_p0 = por %p3580_p13, %p3579_p12 }
  0x46   :  { %3108 = vmatprep.subr.mxu0 %v111_v3  ;;  %279 = vmatpush1.msra.mxu1 %v253_v9  ;;  %v242_v20 = vld [vmem:[#allocation7 + $0xf8] sm:$0xff]  ;;  %v241_v21 = vld [vmem:[#allocation7 + $0xf0] sm:$0xff]  ;;  %v239_v23 = vld [vmem:[#allocation7 + $0xe0] sm:$0xff] }
  0x47   :  { %3109 = vmatpush3.msra.mxu0 %v111_v3  ;;  %280 = vmatprep.subr.mxu1 %v251_v11  ;;  %v105_v22 = vld [vmem:[#allocation5 + $0x30] sm:$0xff]  ;;  %v238_v24 = vld [vmem:[#allocation7 + $0xd8] sm:$0xff]  ;;  %v104_v25 = vld [vmem:[#allocation5 + $0x28] sm:$0xff]  ;;  %p3582_p1 = pnand %p3581_p0, %p3575_p11 }
  0x48   :  { %3110 = vmatprep.subr.mxu0 %v110_v5  ;;  %281 = vmatpush1.msra.mxu1 %v250_v12  ;;  %v236_v26 = vld [vmem:[#allocation7 + $0xc8] sm:$0xff]  ;;  %v235_v27 = vld [vmem:[#allocation7 + $0xc0] sm:$0xff]  ;;  %v233_v29 = vld [vmem:[#allocation7 + $0xb0] sm:$0xff] }
  0x49   :  { %3111 = vmatpush3.msra.mxu0 %v110_v5  ;;  %282 = vmatprep.subr.mxu1 %v248_v14  ;;  %v103_v28 = vld [vmem:[#allocation5 + $0x20] sm:$0xff]  ;;  %v232_v30 = vld [vmem:[#allocation7 + $0xa8] sm:$0xff]  ;;  %v102_v31 = vld [vmem:[#allocation5 + $0x18] sm:$0xff] }
  0x4a   :  { %3112 = vmatprep.subr.mxu0 %v109_v10  ;;  %283 = vmatpush1.msra.mxu1 %v247_v15  ;;  %v230_v32 = vld [vmem:[#allocation7 + $0x98] sm:$0xff]  ;;  %v229_v33 = vld [vmem:[#allocation7 + $0x90] sm:$0xff]  ;;  %v227_v35 = vld [vmem:[#allocation7 + $0x80] sm:$0xff] }
  0x4b   :  { %3113 = vmatpush3.msra.mxu0 %v109_v10  ;;  %284 = vmatprep.subr.mxu1 %v245_v17  ;;  %v101_v34 = vld [vmem:[#allocation5 + $0x10] sm:$0xff]  ;;  %v226_v36 = vld [vmem:[#allocation7 + $0x78] sm:$0xff]  ;;  %v100_v37 = vld [vmem:[#allocation5 + $0x8] sm:$0xff] }
  0x4c   :  { %3114 = vmatprep.subr.mxu0 %v108_v13  ;;  %285 = vmatpush1.msra.mxu1 %v244_v18  ;;  %v224_v38 = vld [vmem:[#allocation7 + $0x68] sm:$0xff]  ;;  %v223_v39 = vld [vmem:[#allocation7 + $0x60] sm:$0xff]  ;;  %v221_v41 = vld [vmem:[#allocation7 + $0x50] sm:$0xff]  ;;  %v261_v18 = vlaneseq }
  0x4d   :  { %3115 = vmatpush3.msra.mxu0 %v108_v13  ;;  %286 = vmatprep.subr.mxu1 %v242_v20  ;;  %v99_v40 = vld [vmem:[#allocation5] sm:$0xff]  ;;  %v220_v42 = vld [vmem:[#allocation7 + $0x48] sm:$0xff]  ;;  %v97_v44 = vld [vmem:[#allocation2 + $0x10] sm:$0xff] }
  0x4e   :  { %3116 = vmatprep.subr.mxu0 %v107_v16  ;;  %287 = vmatpush1.msra.mxu1 %v241_v21  ;;  %v96_v43 = vld [vmem:[#allocation2 + $0x8] sm:$0xff]  ;;  %v98_v45 = vld [vmem:[#allocation2 + $0x18] sm:$0xff]  ;;  %v217_v47 = vld [vmem:[#allocation7 + $0x30] sm:$0xff] }
  0x4f   :  { %3117 = vmatpush3.msra.mxu0 %v107_v16  ;;  %288 = vmatprep.subr.mxu1 %v239_v23  ;;  %v218_v46 = vld [vmem:[#allocation7 + $0x38] sm:$0xff]  ;;  %v215_v48 = vld [vmem:[#allocation7 + $0x20] sm:$0xff]  ;;  %v212_v50 = vld [vmem:[#allocation7 + $0x8] sm:$0xff] }
  0x50   :  { %3118 = vmatprep.subr.mxu0 %v106_v19  ;;  %289 = vmatpush1.msra.mxu1 %v238_v24  ;;  %v214_v49 = vld [vmem:[#allocation7 + $0x18] sm:$0xff]  ;;  %v211_v51 = vld [vmem:[#allocation7] sm:$0xff]  ;;  %v252_v0 = vld [vmem:[#allocation7 + $0x148] sm:$0xff] }
  0x51   :  { %3119 = vmatpush3.msra.mxu0 %v106_v19  ;;  %290 = vmatprep.subr.mxu1 %v236_v26  ;;  %v258_v52 = vld [vmem:[#allocation7 + $0x178] sm:$0xff]  ;;  %v2940_v55 = vld [vmem:[%s3961_s2] ss:$0 sm:$0xff]  ;;  %v249_v2 = vld [vmem:[#allocation7 + $0x130] sm:$0xff]  ;;  %v262_v19 = vshrl.u32 %v261_v18, 7 }
  0x52   :  { %3120 = vmatprep.subr.mxu0 %v105_v22  ;;  %291 = vmatpush1.msra.mxu1 %v235_v27  ;;  %v255_v61 = vld [vmem:[#allocation7 + $0x160] sm:$0xff]  ;;  %v246_v5 = vld [vmem:[#allocation7 + $0x118] sm:$0xff]  ;;  %v240_v8 = vld [vmem:[#allocation7 + $0xe8] sm:$0xff] }
  0x53   :  { %3121 = vmatpush3.msra.mxu0 %v105_v22  ;;  %292 = vmatprep.subr.mxu1 %v233_v29  ;;  %v243_v6 = vld [vmem:[#allocation7 + $0x100] sm:$0xff]  ;;  %v237_v9 = vld [vmem:[#allocation7 + $0xd0] sm:$0xff]  ;;  %v234_v10 = vld [vmem:[#allocation7 + $0xb8] sm:$0xff]  ;;  %v3709_v20 = vsub.s32 1, %v262_v19  ;;  %v3711_v22 = vsub.s32 0, %v262_v19 }
  0x54   :  { %3122 = vmatprep.subr.mxu0 %v104_v25  ;;  %293 = vmatpush1.msra.mxu1 %v232_v30  ;;  %v231_v11 = vld [vmem:[#allocation7 + $0xa0] sm:$0xff]  ;;  %v228_v12 = vld [vmem:[#allocation7 + $0x88] sm:$0xff]  ;;  %v225_v13 = vld [vmem:[#allocation7 + $0x70] sm:$0xff] }
  0x55   :  { %3123 = vmatpush3.msra.mxu0 %v104_v25  ;;  %294 = vmatprep.subr.mxu1 %v230_v32  ;;  %v222_v14 = vld [vmem:[#allocation7 + $0x58] sm:$0xff]  ;;  %v219_v15 = vld [vmem:[#allocation7 + $0x40] sm:$0xff]  ;;  %v216_v16 = vld [vmem:[#allocation7 + $0x28] sm:$0xff] }
  0x56   :  { %3124 = vmatprep.subr.mxu0 %v103_v28  ;;  %295 = vmatpush1.msra.mxu1 %v229_v33  ;;  %v213_v17 = vld [vmem:[#allocation7 + $0x10] sm:$0xff]  ;;  %v259_v21 = vld [vmem:[#allocation8] sm:$0x7]  ;;  %v1119_v18 = vld [vmem:[#allocation7 + $0x2d8] sm:$0xff] }
  0x57   :  { %3125 = vmatpush3.msra.mxu0 %v103_v28  ;;  %296 = vmatprep.subr.mxu1 %v227_v35  ;;  %v268_v23 = vrot.slane %v259_v21, %v3709_v20  ;;  %v264_v25 = vrot.slane %v259_v21, %v3711_v22 }
  0x58   :  { %3126 = vmatprep.subr.mxu0 %v102_v31  ;;  %297 = vmatpush1.msra.mxu1 %v226_v36 }
  0x59   :  { %3127 = vmatpush3.msra.mxu0 %v102_v31  ;;  %298 = vmatprep.subr.mxu1 %v224_v38 }
  0x5a   :  { %3128 = vmatprep.subr.mxu0 %v101_v34  ;;  %299 = vmatpush1.msra.mxu1 %v223_v39 }
  0x5b   :  { %3129 = vmatpush3.msra.mxu0 %v101_v34  ;;  %300 = vmatprep.subr.mxu1 %v221_v41  ;;  %v3725_v41 = vsub.s32 2, %v262_v19  ;;  %v1118_v19 = vld [vmem:[#allocation7 + $0x2d0] sm:$0xff] }
  0x5c   :  { %3130 = vmatprep.subr.mxu0 %v100_v37  ;;  %301 = vmatpush1.msra.mxu1 %v220_v42 }
  0x5d   :  { %3131 = vmatpush3.msra.mxu0 %v100_v37  ;;  %302 = vmatprep.subr.mxu1 %v218_v46  ;;  %v272_v42 = vrot.slane %v259_v21, %v3725_v41  ;;  %v1116_v21 = vld [vmem:[#allocation7 + $0x2c0] sm:$0xff] }
  0x5e   :  { %3132 = vmatprep.subr.mxu0 %v99_v40  ;;  %303 = vmatpush1.msra.mxu1 %v217_v47 }
  0x5f   :  { %3133 = vmatpush3.msra.mxu0 %v99_v40  ;;  %304 = vmatprep.subr.mxu1 %v215_v48 }
  0x60   :  { %3135 = vmatmul.mubr.f32.vlgmr.msra.gmra.mxu0 %v96_v43  ;;  %305 = vmatpush1.msra.mxu1 %v214_v49 }
  0x61   :  { %3137 = vmatprep.mubr.f32.mxu0 %v97_v44  ;;  %306 = vmatprep.subr.mxu1 %v212_v50 }
  0x62   :  { %307 = vmatpush1.msra.mxu1 %v211_v51  ;;  %3178 = vmatprep.subr.mxu0 %v3613_v53 }
  0x63   :  { %3140 = vmatprep.subr.mxu1 %v258_v52 }
  0x64   :  { %3138 = vmatmul.mubr.f32.gmra.mxu0 %v98_v45 }
  0x65   :  { %3180 = vmatprep.mubr.msk.f32.mxu0 %vm3614_vm0, %v3613_v53 }
 0x120   :  { %v3136_v54 = vpop.f32.mrf.mxu0 }
 0x121   :  { %v194_v59 = vadd.f32 %v3136_v54, %v2940_v55 }
 0x122   :  { %v188_v56 = vpop.f32.mrf.mxu0 }
 0x123   :  { %v189_v57 = vadd.f32 %v2940_v55, %v188_v56  ;;  %v3689_v1 = vmax.f32 %v194_v59, 0.0 }
 0x124   :  { %v3139_v58 = vpop.f32.mrf.mxu0 }
 0x125   :  { %v3685_v60 = vmax.f32 %v189_v57, 0.0  ;;  %v204_v3 = vadd.f32 %v3139_v58, %v2940_v55 }
 0x126   :  { %v198_v62 = vpop.f32.mrf.mxu0 }
 0x127   :  { %341 = vmatmul.mubr.f32.vlgmr.msra.gmra.mxu1 %v3685_v60  ;;  %v199_v63 = vadd.f32 %v2940_v55, %v198_v62  ;;  %v3695_v7 = vmax.f32 %v204_v3, 0.0 }
 0x128   :  { %3141 = vmatpush3.msra.mxu1 %v258_v52  ;;  %346 = vmatprep.mubr.f32.mxu1 %v3613_v53 }
 0x129   :  { %3142 = vmatprep.subr.mxu1 %v255_v61  ;;  %v3691_v4 = vmax.f32 %v199_v63, 0.0 }
 0x12a   :  { %3143 = vmatpush3.msra.mxu1 %v255_v61 }
 0x12b   :  { %3144 = vmatprep.subr.mxu1 %v252_v0  ;;  %347 = vmatmul.mubr.f32.gmra.mxu1 %v3689_v1 }
 0x12c   :  { %3145 = vmatpush3.msra.mxu1 %v252_v0  ;;  %352 = vmatprep.mubr.f32.mxu1 %v3613_v53 }
 0x12d   :  { %3146 = vmatprep.subr.mxu1 %v249_v2 }
 0x12e   :  { %3147 = vmatpush3.msra.mxu1 %v249_v2 }
 0x12f   :  { %3148 = vmatprep.subr.mxu1 %v246_v5  ;;  %353 = vmatmul.mubr.f32.gmra.mxu1 %v3691_v4 }
 0x130   :  { %3149 = vmatpush3.msra.mxu1 %v246_v5  ;;  %358 = vmatprep.mubr.f32.mxu1 %v3613_v53 }
 0x131   :  { %3150 = vmatprep.subr.mxu1 %v243_v6 }
 0x132   :  { %3151 = vmatpush3.msra.mxu1 %v243_v6 }
 0x133   :  { %3152 = vmatprep.subr.mxu1 %v240_v8  ;;  %359 = vmatmul.mubr.f32.gmra.mxu1 %v3695_v7 }
 0x134   :  { %3153 = vmatpush3.msra.mxu1 %v240_v8  ;;  %3172 = vmatprep.mubr.f32.mxu1 %v3685_v60 }
 0x135   :  { %3154 = vmatprep.subr.mxu1 %v237_v9 }
 0x136   :  { %3155 = vmatpush3.msra.mxu1 %v237_v9 }
 0x137   :  { %3156 = vmatprep.subr.mxu1 %v234_v10 }
 0x138   :  { %3157 = vmatpush3.msra.mxu1 %v234_v10 }
 0x139   :  { %3158 = vmatprep.subr.mxu1 %v231_v11 }
 0x13a   :  { %3159 = vmatpush3.msra.mxu1 %v231_v11 }
 0x13b   :  { %3160 = vmatprep.subr.mxu1 %v228_v12 }
 0x13c   :  { %3161 = vmatpush3.msra.mxu1 %v228_v12 }
 0x13d   :  { %3162 = vmatprep.subr.mxu1 %v225_v13 }
 0x13e   :  { %3163 = vmatpush3.msra.mxu1 %v225_v13 }
 0x13f   :  { %3164 = vmatprep.subr.mxu1 %v222_v14 }
 0x140   :  { %3165 = vmatpush3.msra.mxu1 %v222_v14 }
 0x141   :  { %3166 = vmatprep.subr.mxu1 %v219_v15 }
 0x142   :  { %3167 = vmatpush3.msra.mxu1 %v219_v15 }
 0x143   :  { %3168 = vmatprep.subr.mxu1 %v216_v16 }
 0x144   :  { %3169 = vmatpush3.msra.mxu1 %v216_v16  ;;  %v1122_v16 = vld [vmem:[#allocation7 + $0x2f0] sm:$0xff] }
 0x145   :  { %3170 = vmatprep.subr.mxu1 %v213_v17 }
 0x146   :  { %3171 = vmatpush3.msra.mxu1 %v213_v17  ;;  %v1121_v17 = vld [vmem:[#allocation7 + $0x2e8] sm:$0xff] }
 0x147   :  { %3173 = vmatmul.mubr.f32.vlgmr.msra.gmra.mxu1 %v3689_v1  ;;  %3188 = vmatprep.subr.mxu1 %v3613_v53 }
 0x148   :  { %3175 = vmatprep.mubr.f32.mxu1 %v3691_v4 }
 0x14b   :  { %3176 = vmatmul.mubr.f32.gmra.mxu1 %v3695_v7 }
 0x14c   :  { %3190 = vmatprep.mubr.msk.f32.mxu1 %vm3614_vm0, %v3613_v53 }
 0x1e7   :  { %v342_v24 = vpop.f32.mrf.mxu1 }
 0x1e8   :  { %v343_v29 = vadd.f32 %v342_v24, %v264_v25  ;;  %v1113_v24 = vld [vmem:[#allocation7 + $0x2a8] sm:$0xff] }
 0x1e9   :  { %v344_v26 = vpop.f32.mrf.mxu1 }
 0x1ea   :  { %v345_v27 = vadd.f32 %v344_v26, %v268_v23  ;;  %v1110_v26 = vld [vmem:[#allocation7 + $0x290] sm:$0xff] }
 0x1eb   :  { %v348_v28 = vpop.f32.mrf.mxu1 }
 0x1ec   :  { %3179 = vmatpush3.xpose.msra.mxu0 %v345_v27  ;;  %v349_v34 = vadd.f32 %v348_v28, %v264_v25  ;;  %v1109_v27 = vld [vmem:[#allocation7 + $0x288] sm:$0xff]  ;;  %v1107_v28 = vld [vmem:[#allocation7 + $0x278] sm:$0xff] }
 0x1ed   :  { %v350_v30 = vpop.f32.mrf.mxu1  ;;  %3183 = vmatprep.subr.mxu0 %v3613_v53 }
 0x1ee   :  { %v351_v31 = vadd.f32 %v350_v30, %v268_v23  ;;  %v1104_v30 = vld [vmem:[#allocation7 + $0x260] sm:$0xff] }
 0x1ef   :  { %3181 = vmatmul.mubr.f32.vlgmr.msra.gmra.mxu0 %v343_v29  ;;  %v354_v32 = vpop.f32.mrf.mxu1  ;;  %v1106_v29 = vld [vmem:[#allocation7 + $0x270] sm:$0xff] }
 0x1f0   :  { %3189 = vmatpush3.xpose.msra.mxu1 %v351_v31  ;;  %v3716_v33 = vadd.f32 %v354_v32, %v264_v25  ;;  %3185 = vmatprep.mubr.msk.f32.mxu0 %vm3614_vm0, %v3613_v53  ;;  %v1103_v31 = vld [vmem:[#allocation7 + $0x258] sm:$0xff]  ;;  %v1101_v32 = vld [vmem:[#allocation7 + $0x248] sm:$0xff] }
 0x1f1   :  { %v356_v35 = vpop.f32.mrf.mxu1  ;;  %3193 = vmatprep.subr.mxu1 %v3613_v53 }
 0x1f2   :  { %v357_v36 = vadd.f32 %v356_v35, %v268_v23  ;;  %v1097_v35 = vld [vmem:[#allocation7 + $0x228] sm:$0xff] }
 0x1f3   :  { %3191 = vmatmul.mubr.f32.vlgmr.msra.gmra.mxu1 %v349_v34  ;;  %v360_v37 = vpop.f32.mrf.mxu1  ;;  %v1098_v34 = vld [vmem:[#allocation7 + $0x230] sm:$0xff] }
 0x1f4   :  { %v3721_v38 = vadd.f32 %v360_v37, %v264_v25  ;;  %3195 = vmatprep.mubr.msk.f32.mxu1 %vm3614_vm0, %v3613_v53  ;;  %v1112_v25 = vld [vmem:[#allocation7 + $0x2a0] sm:$0xff]  ;;  %v1094_v37 = vld [vmem:[#allocation7 + $0x210] sm:$0xff] }
 0x1f5   :  { %v362_v39 = vpop.f32.mrf.mxu1 }
 0x1f6   :  { %v363_v40 = vadd.f32 %v362_v39, %v268_v23  ;;  %v1115_v23 = vld [vmem:[#allocation7 + $0x2b8] sm:$0xff] }
 0x1f7   :  { %v1091_v39 = vld [vmem:[#allocation7 + $0x1f8] sm:$0xff] }
 0x207   :  { %v3174_v43 = vpop.f32.mrf.mxu1 }
 0x208   :  { %v437_v44 = vadd.f32 %v3174_v43, %v272_v42  ;;  %v1086_v43 = vld [vmem:[#allocation7 + $0x1d0] sm:$0xff] }
 0x209   :  { %v431_v45 = vpop.f32.mrf.mxu1 }
 0x20a   :  { %v432_v46 = vadd.f32 %v431_v45, %v272_v42  ;;  %3194 = vmatpush3.msra.mxu1 %v437_v44  ;;  %v1085_v44 = vld [vmem:[#allocation7 + $0x1c8] sm:$0xff]  ;;  %v1083_v45 = vld [vmem:[#allocation7 + $0x1b8] sm:$0xff] }
 0x20b   :  { %v3177_v47 = vpop.f32.mrf.mxu1  ;;  %3198 = vmatprep.subr.mxu1 %v3613_v53 }
 0x20c   :  { %3184 = vmatpush3.msra.mxu0 %v432_v46  ;;  %v3729_v48 = vadd.f32 %v3177_v47, %v272_v42  ;;  %v1082_v46 = vld [vmem:[#allocation7 + $0x1b0] sm:$0xff]  ;;  %v1080_v47 = vld [vmem:[#allocation7 + $0x1a0] sm:$0xff] }
 0x20d   :  { %3208 = vmatprep.subr.mxu0 %v3613_v53  ;;  %v441_v50 = vpop.f32.mrf.mxu1 }
 0x20e   :  { %v442_v15 = vadd.f32 %v441_v50, %v272_v42  ;;  %v1088_v42 = vld [vmem:[#allocation7 + $0x1e0] sm:$0xff]  ;;  %v1077_v50 = vld [vmem:[#allocation7 + $0x188] sm:$0xff] }
 0x2af   :  { %v516_v49 = vpop.f32.mrf.mxu0 }
 0x2b0   :  { %v520_v56 = vmul.f32 0.125, %v516_v49  ;;  %v1079_v49 = vld [vmem:[#allocation7 + $0x198] sm:$0xff] }
 0x2b1   :  { %v3182_v51 = vpop.f32.mrf.mxu0 }
 0x2b2   :  { %v522_v58 = vsel %vm521_vm1, %v520_v56, -inf  ;;  %v1076_v51 = vld [vmem:[#allocation7 + $0x180] sm:$0xff] }
 0x2b3   :  { %v672_v52 = vpop.f32.mrf.mxu1 }
 0x2b4   :  { %v676_v54 = vmul.f32 0.125, %v672_v52 }
 0x2b5   :  { %v3192_v55 = vpop.f32.mrf.mxu1 }
 0x2b6   :  { %v677_v57 = vsel %vm521_vm1, %v676_v54, -inf }
 0x2b7   :  { %678 = vmax.xlane.f32.xlu0 %v677_v57 }
 0x2bb   :  { %523 = vmax.xlane.f32.xlu0 %v522_v58 }
 0x340   :  { %v679_v59 = vpop.xlane.xlu0 %678 }
 0x341   :  { %v680_v61 = vsub.f32 %v676_v54, %v679_v59 }
 0x343   :  { %v681_v62 = vmul.f32 1.442695, %v680_v61 }
 0x344   :  { %v524_v63 = vpop.xlane.xlu0 %523 }
 0x345   :  { %3426 = vpow2.f32 %v681_v62  ;;  %v525_v0 = vsub.f32 %v520_v56, %v524_v63 }
 0x347   :  { %v526_v2 = vmul.f32 1.442695, %v525_v0 }
 0x349   :  { %3428 = vpow2.f32 %v526_v2 }
 0x352   :  { %v3427_v3 = vpop.eup %3426 }
 0x353   :  { %v683_v5 = vsel %vm521_vm1, %v3427_v3, 0.0 }
 0x354   :  { %684 = vadd.xlane.f32.xlu1 %v683_v5 }
 0x356   :  { %v3429_v6 = vpop.eup %3428 }
 0x357   :  { %v528_v8 = vsel %vm521_vm1, %v3429_v6, 0.0 }
 0x358   :  { %529 = vadd.xlane.f32.xlu1 %v528_v8 }
 0x3dd   :  { %v685_v9 = vpop.xlane.xlu1 %684 }
 0x3de   :  { %3430 = vrcp.f32 %v685_v9 }
 0x3e1   :  { %v530_v10 = vpop.xlane.xlu1 %529 }
 0x3e2   :  { %3432 = vrcp.f32 %v530_v10 }
 0x3eb   :  { %v3431_v11 = vpop.eup %3430 }
 0x3ec   :  { %v687_v12 = vmul.f32 %v3431_v11, %v3427_v3 }
 0x3ee   :  { %3196 = vmatmul.mubr.msk.f32.vlgmr.msra.gmra.mxu1 %vm521_vm1, %v687_v12 }
 0x3ef   :  { %v3433_v13 = vpop.eup %3432  ;;  %3199 = vmatpush3.xpose.msra.mxu1 %v357_v36  ;;  %3200 = vmatprep.mubr.msk.f32.mxu1 %vm3614_vm0, %v3613_v53  ;;  %v1095_v36 = vld [vmem:[#allocation7 + $0x218] sm:$0xff] }
 0x3f0   :  { %3203 = vmatprep.subr.mxu1 %v3613_v53  ;;  %v532_v14 = vmul.f32 %v3433_v13, %v3429_v6 }
 0x3f2   :  { %3186 = vmatmul.mubr.msk.f32.vlgmr.msra.gmra.mxu0 %vm521_vm1, %v532_v14  ;;  %3201 = vmatmul.mubr.f32.vlgmr.msra.gmra.mxu1 %v3716_v33  ;;  %v1100_v33 = vld [vmem:[#allocation7 + $0x240] sm:$0xff] }
 0x3f3   :  { %3204 = vmatpush3.msra.mxu1 %v442_v15  ;;  %3209 = vmatpush3.xpose.msra.mxu0 %v363_v40  ;;  %v1089_v40 = vld [vmem:[#allocation7 + $0x1e8] sm:$0xff] }
 0x3f4   :  { %3210 = vmatprep.mubr.msk.f32.mxu0 %vm3614_vm0, %v3613_v53  ;;  %1142 = vmatprep.subr.mxu0 %v1122_v16 }
 0x3f5   :  { %3205 = vmatprep.mubr.msk.f32.mxu1 %vm3614_vm0, %v3613_v53  ;;  %3213 = vmatprep.subr.mxu1 %v3613_v53 }
 0x3f6   :  { %3211 = vmatmul.mubr.f32.vlgmr.msra.gmra.mxu0 %v3721_v38  ;;  %v1092_v38 = vld [vmem:[#allocation7 + $0x200] sm:$0xff] }
 0x3f7   :  { %1143 = vmatpush1.msra.mxu0 %v1121_v17  ;;  %1206 = vmatprep.mubr.f32.mxu0 %v3613_v53  ;;  %v3768_v17 = vld [vmem:[#allocation8 + $0x3] sm:$0x7] }
 0x3f8   :  { %1144 = vmatprep.subr.mxu0 %v1119_v18 }
 0x3f9   :  { %1145 = vmatpush1.msra.mxu0 %v1118_v19  ;;  %v3774_v19 = vrot.slane %v3768_v17, %v3709_v20 }
 0x3fa   :  { %1146 = vmatprep.subr.mxu0 %v1116_v21 }
 0x3fb   :  { %1147 = vmatpush1.msra.mxu0 %v1115_v23 }
 0x3fc   :  { %1148 = vmatprep.subr.mxu0 %v1113_v24 }
 0x3fd   :  { %1149 = vmatpush1.msra.mxu0 %v1112_v25 }
 0x3fe   :  { %1150 = vmatprep.subr.mxu0 %v1110_v26 }
 0x3ff   :  { %1151 = vmatpush1.msra.mxu0 %v1109_v27 }
 0x400   :  { %1152 = vmatprep.subr.mxu0 %v1107_v28  ;;  %v1123_v28 = vld [vmem:[#allocation7 + $0x2f8] sm:$0xff] }
 0x401   :  { %1153 = vmatpush1.msra.mxu0 %v1106_v29 }
 0x402   :  { %1154 = vmatprep.subr.mxu0 %v1104_v30 }
 0x403   :  { %1155 = vmatpush1.msra.mxu0 %v1103_v31  ;;  %v1120_v31 = vld [vmem:[#allocation7 + $0x2e0] sm:$0xff] }
 0x404   :  { %1156 = vmatprep.subr.mxu0 %v1101_v32  ;;  %v1117_v32 = vld [vmem:[#allocation7 + $0x2c8] sm:$0xff] }
 0x405   :  { %1157 = vmatpush1.msra.mxu0 %v1100_v33  ;;  %v1114_v33 = vld [vmem:[#allocation7 + $0x2b0] sm:$0xff] }
 0x406   :  { %1158 = vmatprep.subr.mxu0 %v1098_v34  ;;  %v1111_v34 = vld [vmem:[#allocation7 + $0x298] sm:$0xff] }
 0x407   :  { %1159 = vmatpush1.msra.mxu0 %v1097_v35  ;;  %v1105_v35 = vld [vmem:[#allocation7 + $0x268] sm:$0xff] }
 0x408   :  { %1160 = vmatprep.subr.mxu0 %v1095_v36  ;;  %v1102_v36 = vld [vmem:[#allocation7 + $0x250] sm:$0xff] }
 0x409   :  { %1161 = vmatpush1.msra.mxu0 %v1094_v37  ;;  %v1099_v37 = vld [vmem:[#allocation7 + $0x238] sm:$0xff] }
 0x40a   :  { %1162 = vmatprep.subr.mxu0 %v1092_v38  ;;  %v1096_v38 = vld [vmem:[#allocation7 + $0x220] sm:$0xff] }
 0x40b   :  { %1163 = vmatpush1.msra.mxu0 %v1091_v39  ;;  %v1093_v39 = vld [vmem:[#allocation7 + $0x208] sm:$0xff] }
 0x40c   :  { %1164 = vmatprep.subr.mxu0 %v1089_v40  ;;  %v1090_v40 = vld [vmem:[#allocation7 + $0x1f0] sm:$0xff] }
 0x40d   :  { %1165 = vmatpush1.msra.mxu0 %v1088_v42  ;;  %v1087_v42 = vld [vmem:[#allocation7 + $0x1d8] sm:$0xff] }
 0x40e   :  { %1166 = vmatprep.subr.mxu0 %v1086_v43  ;;  %v1084_v43 = vld [vmem:[#allocation7 + $0x1c0] sm:$0xff] }
 0x40f   :  { %1167 = vmatpush1.msra.mxu0 %v1085_v44  ;;  %v1081_v44 = vld [vmem:[#allocation7 + $0x1a8] sm:$0xff] }
 0x410   :  { %1168 = vmatprep.subr.mxu0 %v1083_v45  ;;  %v1078_v45 = vld [vmem:[#allocation7 + $0x190] sm:$0xff] }
 0x411   :  { %1169 = vmatpush1.msra.mxu0 %v1082_v46 }
 0x412   :  { %1170 = vmatprep.subr.mxu0 %v1080_v47 }
 0x413   :  { %1171 = vmatpush1.msra.mxu0 %v1079_v49 }
 0x414   :  { %1172 = vmatprep.subr.mxu0 %v1077_v50 }
 0x415   :  { %1173 = vmatpush1.msra.mxu0 %v1076_v51 }
 0x416   :  { %3266 = vmatprep.subr.mxu0 %v3613_v53 }
 0x4ae   :  { %v757_v52 = vpop.f32.mrf.mxu1 }
 0x4af   :  { %v3757_v0 = vadd.f32 %v757_v52, %v3689_v1  ;;  %v1130_v52 = vrot.slane %v3768_v17, %v3711_v22 }
 0x4b0   :  { %v3197_v54 = vpop.f32.mrf.mxu1 }
 0x4b2   :  { %v602_v55 = vpop.f32.mrf.mxu0  ;;  %v827_v56 = vpop.f32.mrf.mxu1 }
 0x4b3   :  { %v3751_v57 = vadd.f32 %v602_v55, %v3685_v60  ;;  %v831_v58 = vmul.f32 0.125, %v827_v56 }
 0x4b4   :  { %v3187_v59 = vpop.f32.mrf.mxu0  ;;  %v3202_v61 = vpop.f32.mrf.mxu1 }
 0x4b5   :  { %1207 = vmatmul.mubr.f32.vlgmr.msra.gmra.mxu0 %v3751_v57  ;;  %v832_v62 = vsel %vm521_vm1, %v831_v58, -inf }
 0x4b6   :  { %833 = vmax.xlane.f32.xlu0 %v832_v62  ;;  %v982_v63 = vpop.f32.mrf.mxu0  ;;  %1212 = vmatprep.mubr.f32.mxu0 %v3613_v53 }
 0x4b7   :  { %v986_v2 = vmul.f32 0.125, %v982_v63 }
 0x4b8   :  { %v3212_v3 = vpop.f32.mrf.mxu0 }
 0x4b9   :  { %1213 = vmatmul.mubr.f32.gmra.mxu0 %v3757_v0  ;;  %v987_v60 = vsel %vm521_vm1, %v986_v2, -inf }
 0x4ba   :  { %988 = vmax.xlane.f32.xlu1 %v987_v60  ;;  %1218 = vmatprep.mubr.f32.mxu0 %v3613_v53 }
 0x53f   :  { %v834_v5 = vpop.xlane.xlu0 %833 }
 0x540   :  { %v835_v6 = vsub.f32 %v831_v58, %v834_v5  ;;  %v3816_v58 = vrot.slane %v3768_v17, %v3725_v41 }
 0x542   :  { %v836_v8 = vmul.f32 1.442695, %v835_v6 }
 0x543   :  { %v989_v9 = vpop.xlane.xlu1 %988 }
 0x544   :  { %3434 = vpow2.f32 %v836_v8  ;;  %v990_v10 = vsub.f32 %v986_v2, %v989_v9 }
 0x546   :  { %v991_v11 = vmul.f32 1.442695, %v990_v10 }
 0x548   :  { %3436 = vpow2.f32 %v991_v11 }
 0x551   :  { %v3435_v12 = vpop.eup %3434 }
 0x552   :  { %v838_v1 = vsel %vm521_vm1, %v3435_v12, 0.0 }
 0x553   :  { %839 = vadd.xlane.f32.xlu0 %v838_v1 }
 0x555   :  { %v3437_v13 = vpop.eup %3436 }
 0x556   :  { %v993_v14 = vsel %vm521_vm1, %v3437_v13, 0.0 }
 0x557   :  { %994 = vadd.xlane.f32.xlu1 %v993_v14 }
 0x575   :  { %v3764_v15 = vpop.f32.mrf.mxu0 }
 0x577   :  { %v3766_v16 = vpop.f32.mrf.mxu0 }
 0x578   :  { %v1211_v46 = vadd.f32 %v3766_v16, %v3774_v19 }
 0x579   :  { %v3770_v18 = vpop.f32.mrf.mxu0 }
 0x57a   :  { %v1215_v56 = vadd.f32 %v3770_v18, %v1130_v52 }
 0x57b   :  { %v1216_v21 = vpop.f32.mrf.mxu0 }
 0x57c   :  { %v1217_v23 = vadd.f32 %v1216_v21, %v3774_v19 }
 0x57e   :  { %3267 = vmatpush3.xpose.msra.mxu0 %v1217_v23 }
 0x57f   :  { %3276 = vmatprep.subr.mxu0 %v3613_v53 }
 0x5dc   :  { %v840_v24 = vpop.xlane.xlu0 %839 }
 0x5dd   :  { %3438 = vrcp.f32 %v840_v24 }
 0x5e0   :  { %v995_v25 = vpop.xlane.xlu1 %994 }
 0x5e1   :  { %3440 = vrcp.f32 %v995_v25 }
 0x5ea   :  { %v3439_v26 = vpop.eup %3438 }
 0x5eb   :  { %v842_v27 = vmul.f32 %v3439_v26, %v3435_v12 }
 0x5ed   :  { %3206 = vmatmul.mubr.msk.f32.vlgmr.msra.gmra.mxu1 %vm521_vm1, %v842_v27 }
 0x5ee   :  { %v3441_v29 = vpop.eup %3440  ;;  %3214 = vmatpush3.msra.mxu1 %v3729_v48  ;;  %3215 = vmatprep.mubr.msk.f32.mxu1 %vm3614_vm0, %v3613_v53  ;;  %v1108_v48 = vld [vmem:[#allocation7 + $0x280] sm:$0xff] }
 0x5ef   :  { %3218 = vmatprep.subr.mxu1 %v1123_v28  ;;  %v997_v30 = vmul.f32 %v3441_v29, %v3437_v13 }
 0x5f1   :  { %3216 = vmatmul.mubr.msk.f32.vlgmr.msra.gmra.mxu1 %vm521_vm1, %v997_v30 }
 0x5f2   :  { %3219 = vmatpush3.msra.mxu1 %v1123_v28  ;;  %3250 = vmatprep.mubr.f32.mxu1 %v3751_v57 }
 0x5f3   :  { %3220 = vmatprep.subr.mxu1 %v1120_v31 }
 0x5f4   :  { %3221 = vmatpush3.msra.mxu1 %v1120_v31 }
 0x5f5   :  { %3222 = vmatprep.subr.mxu1 %v1117_v32 }
 0x5f6   :  { %3223 = vmatpush3.msra.mxu1 %v1117_v32 }
 0x5f7   :  { %3224 = vmatprep.subr.mxu1 %v1114_v33 }
 0x5f8   :  { %3225 = vmatpush3.msra.mxu1 %v1114_v33 }
 0x5f9   :  { %3226 = vmatprep.subr.mxu1 %v1111_v34 }
 0x5fa   :  { %3227 = vmatpush3.msra.mxu1 %v1111_v34 }
 0x5fb   :  { %3228 = vmatprep.subr.mxu1 %v1108_v48 }
 0x5fc   :  { %3229 = vmatpush3.msra.mxu1 %v1108_v48 }
 0x5fd   :  { %3230 = vmatprep.subr.mxu1 %v1105_v35 }
 0x5fe   :  { %3231 = vmatpush3.msra.mxu1 %v1105_v35 }
 0x5ff   :  { %3232 = vmatprep.subr.mxu1 %v1102_v36 }
 0x600   :  { %3233 = vmatpush3.msra.mxu1 %v1102_v36 }
 0x601   :  { %3234 = vmatprep.subr.mxu1 %v1099_v37 }
 0x602   :  { %3235 = vmatpush3.msra.mxu1 %v1099_v37 }
 0x603   :  { %3236 = vmatprep.subr.mxu1 %v1096_v38 }
 0x604   :  { %3237 = vmatpush3.msra.mxu1 %v1096_v38 }
 0x605   :  { %3238 = vmatprep.subr.mxu1 %v1093_v39 }
 0x606   :  { %3239 = vmatpush3.msra.mxu1 %v1093_v39 }
 0x607   :  { %3240 = vmatprep.subr.mxu1 %v1090_v40 }
 0x608   :  { %3241 = vmatpush3.msra.mxu1 %v1090_v40 }
 0x609   :  { %3242 = vmatprep.subr.mxu1 %v1087_v42 }
 0x60a   :  { %3243 = vmatpush3.msra.mxu1 %v1087_v42 }
 0x60b   :  { %3244 = vmatprep.subr.mxu1 %v1084_v43 }
 0x60c   :  { %3245 = vmatpush3.msra.mxu1 %v1084_v43 }
 0x60d   :  { %3246 = vmatprep.subr.mxu1 %v1081_v44 }
 0x60e   :  { %3247 = vmatpush3.msra.mxu1 %v1081_v44 }
 0x60f   :  { %3248 = vmatprep.subr.mxu1 %v1078_v45 }
 0x610   :  { %3249 = vmatpush3.msra.mxu1 %v1078_v45 }
 0x611   :  { %3251 = vmatmul.mubr.f32.vlgmr.msra.gmra.mxu1 %v3757_v0  ;;  %3256 = vmatprep.subr.mxu1 %v3613_v53 }
 0x612   :  { %3257 = vmatpush3.xpose.msra.mxu1 %v1211_v46 }
 0x613   :  { %3261 = vmatprep.subr.mxu1 %v3613_v53 }
 0x6ad   :  { %v912_v47 = vpop.f32.mrf.mxu1 }
 0x6ae   :  { %v3790_v49 = vadd.f32 %v912_v47, %v3691_v4  ;;  %v1209_v4 = vadd.f32 %v3764_v15, %v1130_v52 }
 0x6af   :  { %v3207_v50 = vpop.f32.mrf.mxu1 }
 0x6b0   :  { %1219 = vmatmul.mubr.f32.gmra.mxu0 %v3790_v49  ;;  %3253 = vmatprep.mubr.f32.mxu1 %v3790_v49 }
 0x6b1   :  { %v1067_v51 = vpop.f32.mrf.mxu1  ;;  %1224 = vmatprep.mubr.f32.mxu0 %v3613_v53 }
 0x6b2   :  { %v3798_v54 = vadd.f32 %v1067_v51, %v3695_v7 }
 0x6b3   :  { %v3217_v55 = vpop.f32.mrf.mxu1 }
 0x6b4   :  { %1225 = vmatmul.mubr.f32.gmra.mxu0 %v3798_v54  ;;  %3254 = vmatmul.mubr.f32.gmra.mxu1 %v3798_v54 }
 0x6b5   :  { %3258 = vmatprep.mubr.msk.f32.mxu1 %vm3614_vm0, %v3613_v53  ;;  %3268 = vmatprep.mubr.msk.f32.mxu0 %vm3614_vm0, %v3613_v53 }
 0x6b8   :  { %3259 = vmatmul.mubr.f32.vlgmr.msra.gmra.mxu1 %v1209_v4  ;;  %3269 = vmatmul.mubr.f32.vlgmr.msra.gmra.mxu0 %v1215_v56 }
 0x6b9   :  { %3278 = vmatprep.mubr.msk.f32.mxu0 %vm3614_vm0, %v3613_v53  ;;  %3263 = vmatprep.mubr.msk.f32.mxu1 %vm3614_vm0, %v3613_v53 }
 0x6d1   :  { %v3812_v7 = vpop.f32.mrf.mxu1 }
 0x6d3   :  { %v1297_v59 = vpop.f32.mrf.mxu1 }
 0x6d4   :  { %v1298_v61 = vadd.f32 %v1297_v59, %v3816_v58 }
 0x6d6   :  { %3262 = vmatpush3.msra.mxu1 %v1298_v61 }
 0x6d7   :  { %3271 = vmatprep.subr.mxu1 %v3613_v53 }
 0x770   :  { %v1220_v62 = vpop.f32.mrf.mxu0 }
 0x771   :  { %v1221_v5 = vadd.f32 %v1220_v62, %v1130_v52  ;;  %v1986_v62 = vld [vmem:[#allocation7 + $0x468] sm:$0xff] }
 0x772   :  { %v1222_v63 = vpop.f32.mrf.mxu0 }
 0x773   :  { %v1223_v2 = vadd.f32 %v1222_v63, %v3774_v19  ;;  %v1984_v63 = vld [vmem:[#allocation7 + $0x458] sm:$0xff] }
 0x774   :  { %v1226_v3 = vpop.f32.mrf.mxu0  ;;  %v3821_v60 = vpop.f32.mrf.mxu1 }
 0x775   :  { %3277 = vmatpush3.xpose.msra.mxu0 %v1223_v2  ;;  %v1227_v13 = vadd.f32 %v1226_v3, %v1130_v52  ;;  %v1303_v52 = vadd.f32 %v3812_v7, %v3816_v58  ;;  %v1987_v7 = vld [vmem:[#allocation7 + $0x470] sm:$0xff]  ;;  %v1981_v3 = vld [vmem:[#allocation7 + $0x440] sm:$0xff] }
 0x776   :  { %v1228_v6 = vpop.f32.mrf.mxu0  ;;  %v3823_v8 = vpop.f32.mrf.mxu1  ;;  %3286 = vmatprep.subr.mxu0 %v3613_v53  ;;  %v1983_v2 = vld [vmem:[#allocation7 + $0x450] sm:$0xff] }
 0x777   :  { %v1229_v9 = vadd.f32 %v1228_v6, %v3774_v19  ;;  %v1308_v61 = vadd.f32 %v3823_v8, %v3816_v58  ;;  %v1978_v6 = vld [vmem:[#allocation7 + $0x428] sm:$0xff]  ;;  %v1977_v8 = vld [vmem:[#allocation7 + $0x420] sm:$0xff] }
 0x778   :  { %v1382_v10 = vpop.f32.mrf.mxu1  ;;  %v1537_v11 = vpop.f32.mrf.mxu0  ;;  %3279 = vmatmul.mubr.f32.vlgmr.msra.gmra.mxu0 %v1221_v5  ;;  %v1980_v5 = vld [vmem:[#allocation7 + $0x438] sm:$0xff] }
 0x779   :  { %v1386_v12 = vmul.f32 0.125, %v1382_v10  ;;  %v1541_v1 = vmul.f32 0.125, %v1537_v11  ;;  %3287 = vmatpush3.xpose.msra.mxu0 %v1229_v9  ;;  %3288 = vmatprep.mubr.msk.f32.mxu0 %vm3614_vm0, %v3613_v53  ;;  %v1975_v9 = vld [vmem:[#allocation7 + $0x410] sm:$0xff]  ;;  %v1974_v10 = vld [vmem:[#allocation7 + $0x408] sm:$0xff]  ;;  %v1972_v11 = vld [vmem:[#allocation7 + $0x3f8] sm:$0xff] }
 0x77a   :  { %v3260_v14 = vpop.f32.mrf.mxu1  ;;  %v3270_v15 = vpop.f32.mrf.mxu0  ;;  %2007 = vmatprep.subr.mxu0 %v1987_v7 }
 0x77b   :  { %v1542_v16 = vsel %vm521_vm1, %v1541_v1, -inf  ;;  %v1387_v17 = vsel %vm521_vm1, %v1386_v12, -inf  ;;  %v1966_v14 = vld [vmem:[#allocation7 + $0x3c8] sm:$0xff]  ;;  %v1965_v15 = vld [vmem:[#allocation7 + $0x3c0] sm:$0xff] }
 0x77c   :  { %3289 = vmatmul.mubr.f32.vlgmr.msra.gmra.mxu0 %v1227_v13  ;;  %1543 = vmax.xlane.f32.xlu1 %v1542_v16  ;;  %v1968_v13 = vld [vmem:[#allocation7 + $0x3d8] sm:$0xff]  ;;  %v1963_v16 = vld [vmem:[#allocation7 + $0x3b0] sm:$0xff] }
 0x77d   :  { %1388 = vmax.xlane.f32.xlu0 %v1387_v17  ;;  %2071 = vmatprep.mubr.f32.mxu0 %v3613_v53  ;;  %v1962_v17 = vld [vmem:[#allocation7 + $0x3a8] sm:$0xff] }
 0x77e   :  { %2008 = vmatpush1.msra.mxu0 %v1986_v62 }
 0x77f   :  { %2009 = vmatprep.subr.mxu0 %v1984_v63 }
 0x780   :  { %2010 = vmatpush1.msra.mxu0 %v1983_v2 }
 0x781   :  { %2011 = vmatprep.subr.mxu0 %v1981_v3 }
 0x782   :  { %2012 = vmatpush1.msra.mxu0 %v1980_v5 }
 0x783   :  { %2013 = vmatprep.subr.mxu0 %v1978_v6 }
 0x784   :  { %2014 = vmatpush1.msra.mxu0 %v1977_v8 }
 0x785   :  { %2015 = vmatprep.subr.mxu0 %v1975_v9 }
 0x786   :  { %2016 = vmatpush1.msra.mxu0 %v1974_v10 }
 0x787   :  { %2017 = vmatprep.subr.mxu0 %v1972_v11 }
 0x805   :  { %v1544_v21 = vpop.xlane.xlu1 %1543 }
 0x806   :  { %v1389_v18 = vpop.xlane.xlu0 %1388  ;;  %v1545_v23 = vsub.f32 %v1541_v1, %v1544_v21  ;;  %v1969_v1 = vld [vmem:[#allocation7 + $0x3e0] sm:$0xff] }
 0x807   :  { %v1390_v19 = vsub.f32 %v1386_v12, %v1389_v18  ;;  %v1971_v12 = vld [vmem:[#allocation7 + $0x3f0] sm:$0xff]  ;;  %v1960_v18 = vld [vmem:[#allocation7 + $0x398] sm:$0xff]  ;;  %v1957_v21 = vld [vmem:[#allocation7 + $0x380] sm:$0xff] }
 0x808   :  { %v1546_v25 = vmul.f32 1.442695, %v1545_v23  ;;  %2018 = vmatpush1.msra.mxu0 %v1971_v12  ;;  %v1956_v23 = vld [vmem:[#allocation7 + $0x378] sm:$0xff] }
 0x809   :  { %v1391_v24 = vmul.f32 1.442695, %v1390_v19  ;;  %2019 = vmatprep.subr.mxu0 %v1969_v1  ;;  %v1959_v19 = vld [vmem:[#allocation7 + $0x390] sm:$0xff] }
 0x80a   :  { %2020 = vmatpush1.msra.mxu0 %v1968_v13 }
 0x80b   :  { %3442 = vpow2.f32 %v1391_v24  ;;  %2021 = vmatprep.subr.mxu0 %v1966_v14  ;;  %v1954_v24 = vld [vmem:[#allocation7 + $0x368] sm:$0xff] }
 0x80c   :  { %3444 = vpow2.f32 %v1546_v25  ;;  %2022 = vmatpush1.msra.mxu0 %v1965_v15  ;;  %v1953_v25 = vld [vmem:[#allocation7 + $0x360] sm:$0xff] }
 0x80d   :  { %2023 = vmatprep.subr.mxu0 %v1963_v16 }
 0x80e   :  { %2024 = vmatpush1.msra.mxu0 %v1962_v17 }
 0x80f   :  { %2025 = vmatprep.subr.mxu0 %v1960_v18 }
 0x810   :  { %2026 = vmatpush1.msra.mxu0 %v1959_v19 }
 0x811   :  { %2027 = vmatprep.subr.mxu0 %v1957_v21 }
 0x812   :  { %2028 = vmatpush1.msra.mxu0 %v1956_v23 }
 0x813   :  { %2029 = vmatprep.subr.mxu0 %v1954_v24 }
 0x814   :  { %2030 = vmatpush1.msra.mxu0 %v1953_v25 }
 0x818   :  { %v3443_v30 = vpop.eup %3442 }
 0x819   :  { %v1393_v48 = vsel %vm521_vm1, %v3443_v30, 0.0  ;;  %v3445_v35 = vpop.eup %3444 }
 0x81a   :  { %v1548_v36 = vsel %vm521_vm1, %v3445_v35, 0.0 }
 0x838   :  { %v1692_v26 = vpop.f32.mrf.mxu0 }
 0x839   :  { %v1696_v27 = vmul.f32 0.125, %v1692_v26  ;;  %v1951_v26 = vld [vmem:[#allocation7 + $0x350] sm:$0xff] }
 0x83a   :  { %v3280_v28 = vpop.f32.mrf.mxu0  ;;  %2031 = vmatprep.subr.mxu0 %v1951_v26 }
 0x83b   :  { %v1697_v29 = vsel %vm521_vm1, %v1696_v27, -inf  ;;  %v1948_v28 = vld [vmem:[#allocation7 + $0x338] sm:$0xff] }
 0x83c   :  { %v1847_v31 = vpop.f32.mrf.mxu0  ;;  %1698 = vmax.xlane.f32.xlu0 %v1697_v29  ;;  %v1947_v29 = vld [vmem:[#allocation7 + $0x330] sm:$0xff] }
 0x83d   :  { %v1851_v32 = vmul.f32 0.125, %v1847_v31  ;;  %v1944_v31 = vld [vmem:[#allocation7 + $0x318] sm:$0xff] }
 0x83e   :  { %v3290_v33 = vpop.f32.mrf.mxu0 }
 0x83f   :  { %v1852_v34 = vsel %vm521_vm1, %v1851_v32, -inf  ;;  %v1941_v33 = vld [vmem:[#allocation7 + $0x300] sm:$0xff] }
 0x840   :  { %1853 = vmax.xlane.f32.xlu1 %v1852_v34  ;;  %1394 = vadd.xlane.f32.xlu0 %v1393_v48 }
 0x844   :  { %1549 = vadd.xlane.f32.xlu1 %v1548_v36 }
 0x8c5   :  { %v1699_v37 = vpop.xlane.xlu0 %1698 }
 0x8c6   :  { %v1700_v38 = vsub.f32 %v1696_v27, %v1699_v37  ;;  %v1950_v27 = vld [vmem:[#allocation7 + $0x348] sm:$0xff]  ;;  %v1313_v37 = vadd.f32 %v3821_v60, %v3816_v58  ;;  %v1976_v58 = vld [vmem:[#allocation7 + $0x418] sm:$0xff]  ;;  %v1973_v60 = vld [vmem:[#allocation7 + $0x400] sm:$0xff] }
 0x8c7   :  { %2032 = vmatpush1.msra.mxu0 %v1950_v27 }
 0x8c8   :  { %v1701_v39 = vmul.f32 1.442695, %v1700_v38  ;;  %2033 = vmatprep.subr.mxu0 %v1948_v28  ;;  %v1988_v38 = vld [vmem:[#allocation7 + $0x478] sm:$0xff] }
 0x8c9   :  { %v1854_v40 = vpop.xlane.xlu1 %1853  ;;  %v1395_v42 = vpop.xlane.xlu0 %1394  ;;  %2034 = vmatpush1.msra.mxu0 %v1947_v29 }
 0x8ca   :  { %3446 = vpow2.f32 %v1701_v39  ;;  %v1855_v43 = vsub.f32 %v1851_v32, %v1854_v40  ;;  %v1942_v32 = vld [vmem:[#allocation7 + $0x308] sm:$0xff] }
 0x8cb   :  { %3448 = vrcp.f32 %v1395_v42  ;;  %v1985_v42 = vld [vmem:[#allocation7 + $0x460] sm:$0xff] }
 0x8cc   :  { %v1856_v44 = vmul.f32 1.442695, %v1855_v43  ;;  %v1982_v43 = vld [vmem:[#allocation7 + $0x448] sm:$0xff] }
 0x8cd   :  { %v1550_v45 = vpop.xlane.xlu1 %1549 }
 0x8ce   :  { %3450 = vpow2.f32 %v1856_v44  ;;  %v1979_v44 = vld [vmem:[#allocation7 + $0x430] sm:$0xff] }
 0x8cf   :  { %3452 = vrcp.f32 %v1550_v45  ;;  %v1970_v45 = vld [vmem:[#allocation7 + $0x3e8] sm:$0xff] }
 0x8d7   :  { %v3836_v46 = vpop.eup %3446 }
 0x8d8   :  { %v3449_v47 = vpop.eup %3448  ;;  %v1703_v50 = vsel %vm521_vm1, %v3836_v46, 0.0 }
 0x8d9   :  { %1704 = vadd.xlane.f32.xlu0 %v1703_v50  ;;  %v1397_v51 = vmul.f32 %v3449_v47, %v3443_v30  ;;  %v1945_v30 = vld [vmem:[#allocation7 + $0x320] sm:$0xff]  ;;  %v1964_v47 = vld [vmem:[#allocation7 + $0x3b8] sm:$0xff] }
 0x8da   :  { %2035 = vmatprep.subr.mxu0 %v1945_v30  ;;  %v1961_v50 = vld [vmem:[#allocation7 + $0x3a0] sm:$0xff] }
 0x8db   :  { %v3842_v55 = vpop.eup %3450  ;;  %3264 = vmatmul.mubr.msk.f32.vlgmr.msra.gmra.mxu1 %vm521_vm1, %v1397_v51  ;;  %2036 = vmatpush1.msra.mxu0 %v1944_v31  ;;  %v1958_v51 = vld [vmem:[#allocation7 + $0x388] sm:$0xff] }
 0x8dc   :  { %v3453_v4 = vpop.eup %3452  ;;  %3272 = vmatpush3.msra.mxu1 %v1303_v52  ;;  %v1858_v56 = vsel %vm521_vm1, %v3842_v55, 0.0  ;;  %3273 = vmatprep.mubr.msk.f32.mxu1 %vm3614_vm0, %v3613_v53  ;;  %v1955_v52 = vld [vmem:[#allocation7 + $0x370] sm:$0xff] }
 0x8dd   :  { %1859 = vadd.xlane.f32.xlu1 %v1858_v56  ;;  %3281 = vmatprep.subr.mxu1 %v3613_v53  ;;  %v1552_v59 = vmul.f32 %v3453_v4, %v3445_v35  ;;  %v1949_v4 = vld [vmem:[#allocation7 + $0x340] sm:$0xff]  ;;  %v1946_v56 = vld [vmem:[#allocation7 + $0x328] sm:$0xff] }
 0x8de   :  { %2037 = vmatprep.subr.mxu0 %v1942_v32 }
 0x8df   :  { %3274 = vmatmul.mubr.msk.f32.vlgmr.msra.gmra.mxu1 %vm521_vm1, %v1552_v59  ;;  %2038 = vmatpush1.msra.mxu0 %v1941_v33  ;;  %v1943_v59 = vld [vmem:[#allocation7 + $0x310] sm:$0xff] }
 0x8e0   :  { %3282 = vmatpush3.msra.mxu1 %v1308_v61  ;;  %3283 = vmatprep.mubr.msk.f32.mxu1 %vm3614_vm0, %v3613_v53 }
 0x8e1   :  { %3291 = vmatprep.subr.mxu1 %v3613_v53  ;;  %3344 = vmatprep.subr.mxu0 %v3613_v53 }
 0x962   :  { %v1705_v34 = vpop.xlane.xlu0 %1704 }
 0x963   :  { %3454 = vrcp.f32 %v1705_v34 }
 0x966   :  { %v1860_v48 = vpop.xlane.xlu1 %1859 }
 0x967   :  { %3456 = vrcp.f32 %v1860_v48 }
 0x970   :  { %v3455_v35 = vpop.eup %3454 }
 0x971   :  { %v1707_v36 = vmul.f32 %v3455_v35, %v3836_v46  ;;  %v1967_v46 = vld [vmem:[#allocation7 + $0x3d0] sm:$0xff] }
 0x973   :  { %3284 = vmatmul.mubr.msk.f32.vlgmr.msra.gmra.mxu1 %vm521_vm1, %v1707_v36 }
 0x974   :  { %v3457_v39 = vpop.eup %3456  ;;  %3292 = vmatpush3.msra.mxu1 %v1313_v37  ;;  %3293 = vmatprep.mubr.msk.f32.mxu1 %vm3614_vm0, %v3613_v53 }
 0x975   :  { %v1862_v40 = vmul.f32 %v3457_v39, %v3842_v55  ;;  %3296 = vmatprep.subr.mxu1 %v1988_v38  ;;  %v1952_v55 = vld [vmem:[#allocation7 + $0x358] sm:$0xff] }
 0x977   :  { %3294 = vmatmul.mubr.msk.f32.vlgmr.msra.gmra.mxu1 %vm521_vm1, %v1862_v40 }
 0x978   :  { %3297 = vmatpush3.msra.mxu1 %v1988_v38 }
 0x979   :  { %3298 = vmatprep.subr.mxu1 %v1985_v42 }
 0x97a   :  { %3299 = vmatpush3.msra.mxu1 %v1985_v42 }
 0x97b   :  { %3300 = vmatprep.subr.mxu1 %v1982_v43 }
 0x97c   :  { %3301 = vmatpush3.msra.mxu1 %v1982_v43 }
 0x97d   :  { %3302 = vmatprep.subr.mxu1 %v1979_v44 }
 0x97e   :  { %3303 = vmatpush3.msra.mxu1 %v1979_v44 }
 0x97f   :  { %3304 = vmatprep.subr.mxu1 %v1976_v58 }
 0x980   :  { %3305 = vmatpush3.msra.mxu1 %v1976_v58 }
 0x981   :  { %3306 = vmatprep.subr.mxu1 %v1973_v60 }
 0x982   :  { %3307 = vmatpush3.msra.mxu1 %v1973_v60 }
 0x983   :  { %3308 = vmatprep.subr.mxu1 %v1970_v45 }
 0x984   :  { %3309 = vmatpush3.msra.mxu1 %v1970_v45 }
 0x985   :  { %3310 = vmatprep.subr.mxu1 %v1967_v46 }
 0x986   :  { %3311 = vmatpush3.msra.mxu1 %v1967_v46 }
 0x987   :  { %3312 = vmatprep.subr.mxu1 %v1964_v47 }
 0x988   :  { %3313 = vmatpush3.msra.mxu1 %v1964_v47 }
 0x989   :  { %3314 = vmatprep.subr.mxu1 %v1961_v50 }
 0x98a   :  { %3315 = vmatpush3.msra.mxu1 %v1961_v50 }
 0x98b   :  { %3316 = vmatprep.subr.mxu1 %v1958_v51 }
 0x98c   :  { %3317 = vmatpush3.msra.mxu1 %v1958_v51 }
 0x98d   :  { %3318 = vmatprep.subr.mxu1 %v1955_v52 }
 0x98e   :  { %3319 = vmatpush3.msra.mxu1 %v1955_v52 }
 0x98f   :  { %3320 = vmatprep.subr.mxu1 %v1952_v55 }
 0x990   :  { %3321 = vmatpush3.msra.mxu1 %v1952_v55 }
 0x991   :  { %3322 = vmatprep.subr.mxu1 %v1949_v4 }
 0x992   :  { %3323 = vmatpush3.msra.mxu1 %v1949_v4 }
 0x993   :  { %3324 = vmatprep.subr.mxu1 %v1946_v56 }
 0x994   :  { %3325 = vmatpush3.msra.mxu1 %v1946_v56 }
 0x995   :  { %3326 = vmatprep.subr.mxu1 %v1943_v59 }
 0x996   :  { %3327 = vmatpush3.msra.mxu1 %v1943_v59 }
 0x997   :  { %3334 = vmatprep.subr.mxu1 %v3613_v53 }
 0x99b   :  { %v1467_v61 = vpop.f32.mrf.mxu1 }
 0x99c   :  { %v3867_v7 = vadd.f32 %v1467_v61, %v3751_v57 }
 0x99d   :  { %v3265_v62 = vpop.f32.mrf.mxu1 }
 0x99e   :  { %2072 = vmatmul.mubr.f32.vlgmr.msra.gmra.mxu0 %v3867_v7  ;;  %3328 = vmatprep.mubr.f32.mxu1 %v3867_v7 }
 0x99f   :  { %v1622_v63 = vpop.f32.mrf.mxu1  ;;  %2077 = vmatprep.mubr.f32.mxu0 %v3613_v53 }
 0x9a0   :  { %v3873_v2 = vadd.f32 %v1622_v63, %v3757_v0 }
 0x9a1   :  { %v3275_v3 = vpop.f32.mrf.mxu1 }
 0x9a2   :  { %2078 = vmatmul.mubr.f32.gmra.mxu0 %v3873_v2  ;;  %3329 = vmatmul.mubr.f32.vlgmr.msra.gmra.mxu1 %v3873_v2 }
 0x9a3   :  { %2083 = vmatprep.mubr.f32.mxu0 %v3613_v53 }
 0xa33   :  { %v1777_v57 = vpop.f32.mrf.mxu1 }
 0xa34   :  { %v3879_v5 = vadd.f32 %v1777_v57, %v3790_v49  ;;  %v1990_v49 = vld [vmem:[#allocation8 + $0x6] sm:$0x7] }
 0xa35   :  { %v3285_v6 = vpop.f32.mrf.mxu1  ;;  %v1999_v10 = vrot.slane %v1990_v49, %v3709_v20  ;;  %v1995_v12 = vrot.slane %v1990_v49, %v3711_v22  ;;  %v3898_v15 = vrot.slane %v1990_v49, %v3725_v41 }
 0xa36   :  { %2084 = vmatmul.mubr.f32.gmra.mxu0 %v3879_v5  ;;  %3331 = vmatprep.mubr.f32.mxu1 %v3879_v5 }
 0xa37   :  { %v1932_v8 = vpop.f32.mrf.mxu1  ;;  %2089 = vmatprep.mubr.f32.mxu0 %v3613_v53 }
 0xa38   :  { %v3885_v0 = vadd.f32 %v1932_v8, %v3798_v54 }
 0xa39   :  { %v3295_v9 = vpop.f32.mrf.mxu1 }
 0xa3a   :  { %2090 = vmatmul.mubr.f32.gmra.mxu0 %v3885_v0  ;;  %3332 = vmatmul.mubr.f32.gmra.mxu1 %v3885_v0 }
 0xa3b   :  { %3336 = vmatprep.mubr.msk.f32.mxu1 %vm3614_vm0, %v3613_v53  ;;  %3346 = vmatprep.mubr.msk.f32.mxu0 %vm3614_vm0, %v3613_v53 }
 0xa5e   :  { %v2073_v11 = vpop.f32.mrf.mxu0 }
 0xa5f   :  { %v2074_v16 = vadd.f32 %v2073_v11, %v1995_v12 }
 0xa60   :  { %v2075_v1 = vpop.f32.mrf.mxu0 }
 0xa61   :  { %v2076_v54 = vadd.f32 %v2075_v1, %v1999_v10 }
 0xa62   :  { %v2079_v13 = vpop.f32.mrf.mxu0  ;;  %v3895_v14 = vpop.f32.mrf.mxu1 }
 0xa63   :  { %3335 = vmatpush3.xpose.msra.mxu1 %v2076_v54  ;;  %v2080_v22 = vadd.f32 %v2079_v13, %v1995_v12  ;;  %v2168_v1 = vadd.f32 %v3895_v14, %v3898_v15  ;;  %v2824_v14 = vld [vmem:[#allocation10 + $0x78] sm:$0xff] }
 0xa64   :  { %v2081_v17 = vpop.f32.mrf.mxu0  ;;  %v2162_v18 = vpop.f32.mrf.mxu1  ;;  %3339 = vmatprep.subr.mxu1 %v3613_v53 }
 0xa65   :  { %v2082_v19 = vadd.f32 %v2081_v17, %v1999_v10  ;;  %v2163_v20 = vadd.f32 %v2162_v18, %v3898_v15 }
 0xa66   :  { %3337 = vmatmul.mubr.f32.vlgmr.msra.gmra.mxu1 %v2074_v16 }
 0xa67   :  { %3340 = vmatpush3.msra.mxu1 %v2163_v20  ;;  %3345 = vmatpush3.xpose.msra.mxu0 %v2082_v19  ;;  %v2823_v19 = vld [vmem:[#allocation10 + $0x70] sm:$0xff]  ;;  %v2822_v20 = vld [vmem:[#allocation10 + $0x68] sm:$0xff] }
 0xa68   :  { %3354 = vmatprep.subr.mxu0 %v3613_v53  ;;  %3341 = vmatprep.mubr.msk.f32.mxu1 %vm3614_vm0, %v3613_v53 }
 0xa69   :  { %3349 = vmatprep.subr.mxu1 %v3613_v53 }
 0xa6a   :  { %3347 = vmatmul.mubr.f32.vlgmr.msra.gmra.mxu0 %v2080_v22  ;;  %v2821_v22 = vld [vmem:[#allocation10 + $0x60] sm:$0xff] }
 0xa6b   :  { %3356 = vmatprep.mubr.msk.f32.mxu0 %vm3614_vm0, %v3613_v53 }
 0xaf6   :  { %v2085_v41 = vpop.f32.mrf.mxu0 }
 0xaf7   :  { %v2086_v25 = vadd.f32 %v2085_v41, %v1995_v12  ;;  %v2820_v41 = vld [vmem:[#allocation10 + $0x58] sm:$0xff] }
 0xaf8   :  { %v2087_v21 = vpop.f32.mrf.mxu0 }
 0xaf9   :  { %v2088_v23 = vadd.f32 %v2087_v21, %v1999_v10  ;;  %v2819_v21 = vld [vmem:[#allocation10 + $0x50] sm:$0xff] }
 0xafa   :  { %v2091_v24 = vpop.f32.mrf.mxu0  ;;  %v3911_v29 = vpop.f32.mrf.mxu1 }
 0xafb   :  { %3355 = vmatpush3.xpose.msra.mxu0 %v2088_v23  ;;  %v2092_v28 = vadd.f32 %v2091_v24, %v1995_v12  ;;  %v2818_v23 = vld [vmem:[#allocation10 + $0x48] sm:$0xff]  ;;  %v2817_v24 = vld [vmem:[#allocation10 + $0x40] sm:$0xff] }
 0xafc   :  { %v2093_v26 = vpop.f32.mrf.mxu0  ;;  %3364 = vmatprep.subr.mxu0 %v3613_v53  ;;  %v2172_v30 = vpop.f32.mrf.mxu1 }
 0xafd   :  { %v2094_v27 = vadd.f32 %v2093_v26, %v1999_v10  ;;  %v2173_v18 = vadd.f32 %v2172_v30, %v3898_v15  ;;  %v2815_v26 = vld [vmem:[#allocation10 + $0x30] sm:$0xff]  ;;  %v2812_v30 = vld [vmem:[#allocation10 + $0x18] sm:$0xff] }
 0xafe   :  { %3357 = vmatmul.mubr.f32.vlgmr.msra.gmra.mxu0 %v2086_v25  ;;  %v2816_v25 = vld [vmem:[#allocation10 + $0x38] sm:$0xff] }
 0xaff   :  { %3365 = vmatpush3.xpose.msra.mxu0 %v2094_v27  ;;  %3366 = vmatprep.mubr.msk.f32.mxu0 %vm3614_vm0, %v3613_v53  ;;  %v2814_v27 = vld [vmem:[#allocation10 + $0x28] sm:$0xff] }
 0xb00   :  { %3374 = vmatprep.subr.mxu0 %v2824_v14 }
 0xb02   :  { %3367 = vmatmul.mubr.f32.vlgmr.msra.gmra.mxu0 %v2092_v28  ;;  %v2813_v28 = vld [vmem:[#allocation10 + $0x20] sm:$0xff] }
 0xb03   :  { %3375 = vmatpush3.msra.mxu0 %v2824_v14 }
 0xb04   :  { %3376 = vmatprep.subr.mxu0 %v2823_v19 }
 0xb05   :  { %3377 = vmatpush3.msra.mxu0 %v2823_v19 }
 0xb06   :  { %3378 = vmatprep.subr.mxu0 %v2822_v20 }
 0xb07   :  { %3379 = vmatpush3.msra.mxu0 %v2822_v20 }
 0xb08   :  { %3380 = vmatprep.subr.mxu0 %v2821_v22 }
 0xb09   :  { %3381 = vmatpush3.msra.mxu0 %v2821_v22 }
 0xb0a   :  { %3382 = vmatprep.subr.mxu0 %v2820_v41 }
 0xb0b   :  { %3383 = vmatpush3.msra.mxu0 %v2820_v41 }
 0xb0c   :  { %3384 = vmatprep.subr.mxu0 %v2819_v21 }
 0xb0d   :  { %3385 = vmatpush3.msra.mxu0 %v2819_v21 }
 0xb0e   :  { %3386 = vmatprep.subr.mxu0 %v2818_v23 }
 0xb0f   :  { %3387 = vmatpush3.msra.mxu0 %v2818_v23 }
 0xb10   :  { %3388 = vmatprep.subr.mxu0 %v2817_v24 }
 0xb11   :  { %3389 = vmatpush3.msra.mxu0 %v2817_v24 }
 0xb12   :  { %3390 = vmatprep.subr.mxu0 %v2816_v25 }
 0xb13   :  { %3391 = vmatpush3.msra.mxu0 %v2816_v25 }
 0xb14   :  { %3392 = vmatprep.subr.mxu0 %v2815_v26 }
 0xb15   :  { %3393 = vmatpush3.msra.mxu0 %v2815_v26 }
 0xb16   :  { %3394 = vmatprep.subr.mxu0 %v2814_v27 }
 0xb17   :  { %3395 = vmatpush3.msra.mxu0 %v2814_v27 }
 0xb18   :  { %3396 = vmatprep.subr.mxu0 %v2813_v28 }
 0xb19   :  { %3397 = vmatpush3.msra.mxu0 %v2813_v28 }
 0xb1a   :  { %3398 = vmatprep.subr.mxu0 %v2812_v30 }
 0xb1b   :  { %3399 = vmatpush3.msra.mxu0 %v2812_v30 }
 0xb26   :  { %v2247_v31 = vpop.f32.mrf.mxu1 }
 0xb27   :  { %v2251_v32 = vmul.f32 0.125, %v2247_v31  ;;  %v2811_v31 = vld [vmem:[#allocation10 + $0x10] sm:$0xff] }
 0xb28   :  { %v3338_v33 = vpop.f32.mrf.mxu1  ;;  %3400 = vmatprep.subr.mxu0 %v2811_v31 }
 0xb29   :  { %v2252_v34 = vsel %vm521_vm1, %v2251_v32, -inf  ;;  %3401 = vmatpush3.msra.mxu0 %v2811_v31  ;;  %v2809_v33 = vld [vmem:[#allocation10] sm:$0xff] }
 0xb2a   :  { %v2402_v48 = vpop.f32.mrf.mxu0  ;;  %2253 = vmax.xlane.f32.xlu0 %v2252_v34 }
 0xb2b   :  { %v2406_v35 = vmul.f32 0.125, %v2402_v48 }
 0xb2c   :  { %v3348_v36 = vpop.f32.mrf.mxu0 }
 0xb2d   :  { %v2407_v37 = vsel %vm521_vm1, %v2406_v35, -inf }
 0xb2e   :  { %2408 = vmax.xlane.f32.xlu1 %v2407_v37  ;;  %v2178_v37 = vadd.f32 %v3911_v29, %v3898_v15 }
 0xbb3   :  { %v2254_v38 = vpop.xlane.xlu0 %2253 }
 0xbb4   :  { %v2255_v39 = vsub.f32 %v2251_v32, %v2254_v38  ;;  %v2810_v32 = vld [vmem:[#allocation10 + $0x8] sm:$0xff] }
 0xbb5   :  { %3402 = vmatprep.subr.mxu0 %v2810_v32 }
 0xbb6   :  { %v2256_v40 = vmul.f32 1.442695, %v2255_v39  ;;  %3403 = vmatpush3.msra.mxu0 %v2810_v32 }
 0xbb7   :  { %v2409_v42 = vpop.xlane.xlu1 %2408  ;;  %3404 = vmatprep.subr.mxu0 %v2809_v33 }
 0xbb8   :  { %3458 = vpow2.f32 %v2256_v40  ;;  %v2410_v43 = vsub.f32 %v2406_v35, %v2409_v42  ;;  %3405 = vmatpush3.msra.mxu0 %v2809_v33 }
 0xbba   :  { %v2411_v44 = vmul.f32 1.442695, %v2410_v43 }
 0xbbc   :  { %3460 = vpow2.f32 %v2411_v44 }
 0xbbe   :  { %v2557_v58 = vpop.f32.mrf.mxu0 }
 0xbbf   :  { %v2561_v60 = vmul.f32 0.125, %v2557_v58 }
 0xbc0   :  { %v3358_v45 = vpop.f32.mrf.mxu0 }
 0xbc1   :  { %v2562_v46 = vsel %vm521_vm1, %v2561_v60, -inf }
 0xbc2   :  { %v2712_v47 = vpop.f32.mrf.mxu0  ;;  %2563 = vmax.xlane.f32.xlu0 %v2562_v46 }
 0xbc3   :  { %v2716_v50 = vmul.f32 0.125, %v2712_v47 }
 0xbc4   :  { %v3368_v51 = vpop.f32.mrf.mxu0 }
 0xbc5   :  { %v3459_v52 = vpop.eup %3458  ;;  %v2717_v55 = vsel %vm521_vm1, %v2716_v50, -inf }
 0xbc6   :  { %2718 = vmax.xlane.f32.xlu1 %v2717_v55  ;;  %v2258_v4 = vsel %vm521_vm1, %v3459_v52, 0.0 }
 0xbc7   :  { %2259 = vadd.xlane.f32.xlu0 %v2258_v4 }
 0xbc9   :  { %v3461_v56 = vpop.eup %3460 }
 0xbca   :  { %v2413_v59 = vsel %vm521_vm1, %v3461_v56, 0.0 }
 0xbcb   :  { %2414 = vadd.xlane.f32.xlu1 %v2413_v59 }
 0xc4b   :  { %v2564_v61 = vpop.xlane.xlu0 %2563 }
 0xc4c   :  { %v2565_v62 = vsub.f32 %v2561_v60, %v2564_v61 }
 0xc4e   :  { %v2566_v63 = vmul.f32 1.442695, %v2565_v62 }
 0xc4f   :  { %v2719_v3 = vpop.xlane.xlu1 %2718 }
 0xc50   :  { %3462 = vpow2.f32 %v2566_v63  ;;  %v2720_v57 = vsub.f32 %v2716_v50, %v2719_v3  ;;  %v2260_v6 = vpop.xlane.xlu0 %2259 }
 0xc51   :  { %3464 = vrcp.f32 %v2260_v6 }
 0xc52   :  { %v2721_v8 = vmul.f32 1.442695, %v2720_v57 }
 0xc54   :  { %3466 = vpow2.f32 %v2721_v8  ;;  %v2415_v9 = vpop.xlane.xlu1 %2414 }
 0xc55   :  { %3468 = vrcp.f32 %v2415_v9 }
 0xc5d   :  { %v3919_v49 = vpop.eup %3462 }
 0xc5e   :  { %v3465_v10 = vpop.eup %3464  ;;  %v2568_v11 = vsel %vm521_vm1, %v3919_v49, 0.0 }
 0xc5f   :  { %2569 = vadd.xlane.f32.xlu0 %v2568_v11  ;;  %v2262_v12 = vmul.f32 %v3465_v10, %v3459_v52 }
 0xc61   :  { %v3925_v54 = vpop.eup %3466  ;;  %3342 = vmatmul.mubr.msk.f32.vlgmr.msra.gmra.mxu1 %vm521_vm1, %v2262_v12 }
 0xc62   :  { %v3469_v13 = vpop.eup %3468  ;;  %3350 = vmatpush3.msra.mxu1 %v2168_v1  ;;  %v2723_v16 = vsel %vm521_vm1, %v3925_v54, 0.0  ;;  %3351 = vmatprep.mubr.msk.f32.mxu1 %vm3614_vm0, %v3613_v53 }
 0xc63   :  { %2724 = vadd.xlane.f32.xlu1 %v2723_v16  ;;  %3359 = vmatprep.subr.mxu1 %v3613_v53  ;;  %v2417_v17 = vmul.f32 %v3469_v13, %v3461_v56 }
 0xc65   :  { %3352 = vmatmul.mubr.msk.f32.vlgmr.msra.gmra.mxu1 %vm521_vm1, %v2417_v17 }
 0xc66   :  { %3360 = vmatpush3.msra.mxu1 %v2173_v18  ;;  %3361 = vmatprep.mubr.msk.f32.mxu1 %vm3614_vm0, %v3613_v53 }
 0xc67   :  { %3369 = vmatprep.subr.mxu1 %v3613_v53 }
 0xce8   :  { %v2570_v34 = vpop.xlane.xlu0 %2569 }
 0xce9   :  { %3470 = vrcp.f32 %v2570_v34 }
 0xcec   :  { %v2725_v48 = vpop.xlane.xlu1 %2724 }
 0xced   :  { %3472 = vrcp.f32 %v2725_v48 }
 0xcf6   :  { %v3471_v35 = vpop.eup %3470 }
 0xcf7   :  { %v2572_v36 = vmul.f32 %v3471_v35, %v3919_v49 }
 0xcf9   :  { %3362 = vmatmul.mubr.msk.f32.vlgmr.msra.gmra.mxu1 %vm521_vm1, %v2572_v36 }
 0xcfa   :  { %v3473_v38 = vpop.eup %3472  ;;  %3370 = vmatpush3.msra.mxu1 %v2178_v37  ;;  %3371 = vmatprep.mubr.msk.f32.mxu1 %vm3614_vm0, %v3613_v53 }
 0xcfb   :  { %v2727_v39 = vmul.f32 %v3473_v38, %v3925_v54 }
 0xcfd   :  { %3372 = vmatmul.mubr.msk.f32.vlgmr.msra.gmra.mxu1 %vm521_vm1, %v2727_v39 }
 0xd21   :  { %v2332_v40 = vpop.f32.mrf.mxu1 }
 0xd22   :  { %v2801_v42 = vadd.f32 %v2332_v40, %v3867_v7 }
 0xd23   :  { %v3343_v43 = vpop.f32.mrf.mxu1 }
 0xd24   :  { %v2805_v44 = vmax.f32 %v2801_v42, 0.0 }
 0xd25   :  { %v2487_v58 = vpop.f32.mrf.mxu1 }
 0xd26   :  { %v2802_v60 = vadd.f32 %v2487_v58, %v3873_v2  ;;  %3406 = vmatprep.mubr.f32.mxu0 %v2805_v44  ;;  %v2953_v2 = vld [vmem:[%s3965_s6] ss:$0 sm:$0xff] }
 0xd27   :  { %v3353_v15 = vpop.f32.mrf.mxu1 }
 0xd28   :  { %v2806_v29 = vmax.f32 %v2802_v60, 0.0 }
 0xd2a   :  { %3407 = vmatmul.mubr.f32.vlgmr.msra.gmra.mxu0 %v2806_v29 }
 0xdb9   :  { %v2642_v45 = vpop.f32.mrf.mxu1 }
 0xdba   :  { %v2803_v46 = vadd.f32 %v2642_v45, %v3879_v5 }
 0xdbb   :  { %v3363_v53 = vpop.f32.mrf.mxu1 }
 0xdbc   :  { %v2807_v47 = vmax.f32 %v2803_v46, 0.0 }
 0xdbd   :  { %v2797_v50 = vpop.f32.mrf.mxu1 }
 0xdbe   :  { %v2804_v51 = vadd.f32 %v2797_v50, %v3885_v0  ;;  %3409 = vmatprep.mubr.f32.mxu0 %v2807_v47 }
 0xdbf   :  { %v3373_v52 = vpop.f32.mrf.mxu1 }
 0xdc0   :  { %v2808_v7 = vmax.f32 %v2804_v51, 0.0 }
 0xdc2   :  { %3410 = vmatmul.mubr.f32.gmra.mxu0 %v2808_v7 }
 0xdea   :  { %v3408_v55 = vpop.f32.mrf.mxu0 }
 0xdeb   :  { %v2904_v4 = vadd.f32 %v3408_v55, %v2953_v2 }
 0xdec   :  { %v2898_v56 = vpop.f32.mrf.mxu0 }
 0xded   :  { %2918 = vst [vmem:[#allocation11 + $0x8] sm:$0xff] %v2904_v4  ;;  %v2899_v59 = vadd.f32 %v2953_v2, %v2898_v56 }
 0xdef   :  { %2917 = vst [vmem:[#allocation11] sm:$0xff] %v2899_v59 }
 0xe82   :  { %v3411_v5 = vpop.f32.mrf.mxu0 }
 0xe83   :  { %v2914_v61 = vadd.f32 %v3411_v5, %v2953_v2 }
 0xe84   :  { %v2908_v62 = vpop.f32.mrf.mxu0 }
 0xe85   :  { %2920 = vst [vmem:[#allocation11 + $0x18] sm:$0xff] %v2914_v61  ;;  %v2909_v0 = vadd.f32 %v2953_v2, %v2908_v62 }
 0xe87   :  { %2919 = vst [vmem:[#allocation11 + $0x10] sm:$0xff] %v2909_v0 }
 0xe88   :  { %3585 = shalt.err (!%p3582_p1)
}
 0xe89   :  { %2932 = dma.vmem_to_hbm [thread:$0]  %s2927_s11, 512, %s3966_s7, [#allocation4], %s3604_s29, %s3604_s29, %s3605_s30  }
 0xe8a   :  { %3600 = dma.done.wait [#allocation4], 512  }
 0xe8b   :  { %3601 = vsyncadd [#allocation4], 4294966784 }
 0xe8c   :  { %2936 = vsyncpa [#allocation3], 1 }
 0xe8d   :  { %2937 = vsyncpa [#allocation6], 1 }
 0xe8e   :  { %2938 = vsyncpa [#allocation9], 1 }
 0xe8f   :  { %2939 = vsyncpa [#allocation4], 1 }

</bundles_post_ra>
